<compile_context>
chip_gen: v7x
topology: tpu7x:2x2x1
jax: 0.10.0
libtpu: 0.0.40
codegen_flags: <defaults>
</compile_context>

<pallas_src>
import math
from functools import partial

import jax
import jax.numpy as jnp
from jax.experimental import pallas as pl
from jax.experimental.pallas import tpu as pltpu


# ----------------------------------------------------------------------------
# tile-size helpers (satisfy the (8, 128) block constraints at any model size)
# ----------------------------------------------------------------------------
def _sub_tile(dim, pref=256):
    """Tile for a second-to-last (sublane) dim: multiple of 8, or the full dim."""
    if dim <= pref:
        return dim
    for t in (pref, 256, 128, 64, 32, 16, 8):
        if t <= pref and dim % t == 0:
            return t
    return dim


def _lane_tile(dim, pref=512):
    """Tile for a last (lane) dim: multiple of 128, or the full dim."""
    if dim <= pref:
        return dim
    for t in (pref, 512, 256, 128):
        if t <= pref and dim % t == 0:
            return t
    return dim


# ----------------------------------------------------------------------------
# Fused (pre-LN) + matmul + bias (+ ReLU) (+ residual) kernel
# grid = (M_tiles, N_tiles); full contraction dim K per block (K = d_model/d_ff)
# ----------------------------------------------------------------------------
def _fused_linear_kernel(x_ref, *rest, has_ln, relu, has_res):
    i = 0
    if has_ln:
        g_ref, beta_ref = rest[i], rest[i + 1]
        i += 2
    w_ref, b_ref = rest[i], rest[i + 1]
    i += 2
    if has_res:
        r_ref = rest[i]
        i += 1
    o_ref = rest[i]

    x = x_ref[...]
    if has_ln:                      # LayerNorm statistics in f32
        x = x.astype(jnp.float32)
        mu = jnp.mean(x, axis=-1, keepdims=True)
        xc = x - mu
        var = jnp.mean(xc * xc, axis=-1, keepdims=True)
        x = xc * jax.lax.rsqrt(var + 1e-6) * g_ref[...] + beta_ref[...]
    h = jnp.dot(x.astype(jnp.bfloat16), w_ref[...],
                preferred_element_type=jnp.float32)
    h = h + b_ref[...]
    if relu:
        h = jnp.maximum(h, 0.0)
    if has_res:
        h = h + r_ref[...].astype(jnp.float32)
    o_ref[...] = h.astype(o_ref.dtype)


def fused_linear(x, w, b, *, ln=None, relu=False, residual=None,
                 out_dtype=jnp.float32, tm_pref=256, tn_pref=256):
    M, K = x.shape
    N = w.shape[1]
    tm = _sub_tile(M, tm_pref)
    tn = _lane_tile(N, tn_pref)
    grid = (M // tm, N // tn)

    in_specs = [pl.BlockSpec((tm, K), lambda i, j: (i, 0))]
    args = [x]
    if ln is not None:
        g, beta = ln
        in_specs += [pl.BlockSpec((1, K), lambda i, j: (0, 0)),
                     pl.BlockSpec((1, K), lambda i, j: (0, 0))]
        args += [g, beta]
    in_specs += [pl.BlockSpec((K, tn), lambda i, j: (0, j)),
                 pl.BlockSpec((1, tn), lambda i, j: (0, j))]
    args += [w, b]
    if residual is not None:
        in_specs.append(pl.BlockSpec((tm, tn), lambda i, j: (i, j)))
        args.append(residual)

    bytes_acc = int(x.size * x.dtype.itemsize + w.size * w.dtype.itemsize
                    + M * N * jnp.dtype(out_dtype).itemsize
                    + (residual.size * residual.dtype.itemsize
                       if residual is not None else 0))
    return pl.pallas_call(
        partial(_fused_linear_kernel, has_ln=ln is not None, relu=relu,
                has_res=residual is not None),
        out_shape=jax.ShapeDtypeStruct((M, N), out_dtype),
        grid=grid,
        in_specs=in_specs,
        out_specs=pl.BlockSpec((tm, tn), lambda i, j: (i, j)),
        compiler_params=pltpu.CompilerParams(
            dimension_semantics=("parallel", "parallel")),
        cost_estimate=pl.CostEstimate(flops=2 * M * N * K, transcendentals=0,
                                      bytes_accessed=bytes_acc),
    )(*args)


# ----------------------------------------------------------------------------
# Flash-style attention: grid = (B, H, kv_blocks), online softmax in VMEM.
# The boolean mask ([B, 1, Tk] pad mask or [B, Tq, Tk] subsequent mask) is
# applied in-kernel; no additive [B*H, Tq, Tk] tensor is ever built.
# ----------------------------------------------------------------------------
def _flash_attn_kernel(mask_ref, q_ref, k_ref, v_ref, o_ref,
                       m_s, l_s, acc_s, *, scale):
    kv = pl.program_id(2)

    @pl.when(kv == 0)
    def _():
        m_s[...] = jnp.full(m_s.shape, -jnp.inf, jnp.float32)
        l_s[...] = jnp.zeros(l_s.shape, jnp.float32)
        acc_s[...] = jnp.zeros(acc_s.shape, jnp.float32)

    q = q_ref[...]                                   # (Tq, dh) bf16
    k = k_ref[...]                                   # (tk, dh) bf16
    s = jax.lax.dot_general(q, k, (((1,), (1,)), ((), ())),
                            preferred_element_type=jnp.float32) * scale
    s = jnp.where(mask_ref[...] > 0.0, s, -1e9)      # (Mq, tk) broadcasts over Tq

    m_prev = m_s[...]
    m_new = jnp.maximum(m_prev, jnp.max(s, axis=-1, keepdims=True))
    alpha = jnp.exp(m_prev - m_new)
    p = jnp.exp(s - m_new)
    l_s[...] = alpha * l_s[...] + jnp.sum(p, axis=-1, keepdims=True)
    acc_s[...] = alpha * acc_s[...] + jnp.dot(
        p.astype(jnp.bfloat16), v_ref[...], preferred_element_type=jnp.float32)
    m_s[...] = m_new

    @pl.when(kv == pl.num_programs(2) - 1)
    def _():
        o_ref[...] = (acc_s[...] *
                      pl.reciprocal(l_s[...], approx=True)).astype(o_ref.dtype)


def flash_attention(q, k, v, mask_f32):
    # q: [B,H,Tq,dh] bf16, k/v: [B,H,Tk,dh] bf16, mask_f32: [B, 1 or Tq, Tk] f32
    B, H, Tq, dh = q.shape
    Tk = k.shape[2]
    Mq = mask_f32.shape[1]
    tk = _lane_tile(Tk, 512)
    grid = (B, H, Tk // tk)
    scale = 1.0 / math.sqrt(dh)
    bytes_acc = int(2 * (q.size + k.size + v.size + B * H * Tq * dh)
                    + 4 * mask_f32.size)
    # TODO(synk): Tq is kept as one block (fine for seq <= a few K); a q-tile
    # grid axis would be added for longer sequences.
    return pl.pallas_call(
        partial(_flash_attn_kernel, scale=scale),
        out_shape=jax.ShapeDtypeStruct((B, H, Tq, dh), jnp.bfloat16),
        grid=grid,
        in_specs=[
            pl.BlockSpec((None, Mq, tk), lambda b, h, kv: (b, 0, kv)),
            pl.BlockSpec((None, None, Tq, dh), lambda b, h, kv: (b, h, 0, 0)),
            pl.BlockSpec((None, None, tk, dh), lambda b, h, kv: (b, h, kv, 0)),
            pl.BlockSpec((None, None, tk, dh), lambda b, h, kv: (b, h, kv, 0)),
        ],
        out_specs=pl.BlockSpec((None, None, Tq, dh), lambda b, h, kv: (b, h, 0, 0)),
        scratch_shapes=[pltpu.VMEM((Tq, 1), jnp.float32),
                        pltpu.VMEM((Tq, 1), jnp.float32),
                        pltpu.VMEM((Tq, dh), jnp.float32)],
        compiler_params=pltpu.CompilerParams(
            dimension_semantics=("parallel", "parallel", "arbitrary")),
        cost_estimate=pl.CostEstimate(flops=4 * B * H * Tq * Tk * dh,
                                      transcendentals=B * H * Tq * Tk,
                                      bytes_accessed=bytes_acc),
    )(mask_f32, q, k, v)


# ----------------------------------------------------------------------------
# Tied output projection: fused final-LN + matmul tiled over vocab + online
# logsumexp (pass 1), then a tiny elementwise correction pass (pass 2).
# ----------------------------------------------------------------------------
def _proj_lse_kernel(x_ref, g_ref, beta_ref, w_ref, b_ref,
                     logits_ref, lse_ref, m_s, s_s):
    j = pl.program_id(1)

    @pl.when(j == 0)
    def _():
        m_s[...] = jnp.full(m_s.shape, -jnp.inf, jnp.float32)
        s_s[...] = jnp.zeros(s_s.shape, jnp.float32)

    x = x_ref[...].astype(jnp.float32)
    mu = jnp.mean(x, axis=-1, keepdims=True)
    xc = x - mu
    var = jnp.mean(xc * xc, axis=-1, keepdims=True)
    xn = xc * jax.lax.rsqrt(var + 1e-6) * g_ref[...] + beta_ref[...]

    logits = jnp.dot(xn.astype(jnp.bfloat16), w_ref[...],
                     preferred_element_type=jnp.float32) + b_ref[...]
    logits_ref[...] = logits

    m_prev = m_s[...]
    m_new = jnp.maximum(m_prev, jnp.max(logits, axis=-1, keepdims=True))
    s_s[...] = s_s[...] * jnp.exp(m_prev - m_new) + jnp.sum(
        jnp.exp(logits - m_new), axis=-1, keepdims=True)
    m_s[...] = m_new

    @pl.when(j == pl.num_programs(1) - 1)
    def _():
        lse_ref[...] = m_s[...] + jnp.log(s_s[...])


def _sub_lse_kernel(logits_ref, lse_ref, o_ref):
    o_ref[...] = logits_ref[...] - lse_ref[...]


def proj_log_softmax(x, ln, w_t, b, *, tm_pref=256, tv_pref=512):
    M, D = x.shape
    V = w_t.shape[1]
    g, beta = ln
    tm = _sub_tile(M, tm_pref)
    tv = _lane_tile(V, tv_pref)
    grid = (M // tm, V // tv)

    logits, lse = pl.pallas_call(
        _proj_lse_kernel,
        out_shape=(jax.ShapeDtypeStruct((M, V), jnp.float32),
                   jax.ShapeDtypeStruct((M, 1), jnp.float32)),
        grid=grid,
        in_specs=[pl.BlockSpec((tm, D), lambda i, j: (i, 0)),
                  pl.BlockSpec((1, D), lambda i, j: (0, 0)),
                  pl.BlockSpec((1, D), lambda i, j: (0, 0)),
                  pl.BlockSpec((D, tv), lambda i, j: (0, j)),
                  pl.BlockSpec((1, tv), lambda i, j: (0, j))],
        out_specs=(pl.BlockSpec((tm, tv), lambda i, j: (i, j)),
                   pl.BlockSpec((tm, 1), lambda i, j: (i, 0))),
        scratch_shapes=[pltpu.VMEM((tm, 1), jnp.float32),
                        pltpu.VMEM((tm, 1), jnp.float32)],
        compiler_params=pltpu.CompilerParams(
            dimension_semantics=("parallel", "arbitrary")),
        cost_estimate=pl.CostEstimate(flops=2 * M * D * V, transcendentals=M * V,
                                      bytes_accessed=int(4*M*D + 2*D*V + 4*M*V)),
    )(x, g, beta, w_t, b)

    return pl.pallas_call(
        _sub_lse_kernel,
        out_shape=jax.ShapeDtypeStruct((M, V), jnp.float32),
        grid=grid,
        in_specs=[pl.BlockSpec((tm, tv), lambda i, j: (i, j)),
                  pl.BlockSpec((tm, 1), lambda i, j: (i, 0))],
        out_specs=pl.BlockSpec((tm, tv), lambda i, j: (i, j)),
        compiler_params=pltpu.CompilerParams(
            dimension_semantics=("parallel", "parallel")),
    )(logits, lse)


# ----------------------------------------------------------------------------
# Standalone LayerNorm (encoder final norm) and embedding scale + pos-enc add
# ----------------------------------------------------------------------------
def _layernorm_kernel(x_ref, g_ref, b_ref, o_ref):
    x = x_ref[...].astype(jnp.float32)
    mu = jnp.mean(x, axis=-1, keepdims=True)
    xc = x - mu
    var = jnp.mean(xc * xc, axis=-1, keepdims=True)
    o_ref[...] = xc * jax.lax.rsqrt(var + 1e-6) * g_ref[...] + b_ref[...]


def layernorm(x, g, b, *, tm_pref=256):
    M, D = x.shape
    tm = _sub_tile(M, tm_pref)
    return pl.pallas_call(
        _layernorm_kernel,
        out_shape=jax.ShapeDtypeStruct((M, D), jnp.float32),
        grid=(M // tm,),
        in_specs=[pl.BlockSpec((tm, D), lambda i: (i, 0)),
                  pl.BlockSpec((1, D), lambda i: (0, 0)),
                  pl.BlockSpec((1, D), lambda i: (0, 0))],
        out_specs=pl.BlockSpec((tm, D), lambda i: (i, 0)),
        compiler_params=pltpu.CompilerParams(dimension_semantics=("parallel",)),
    )(x, g, b)


def _embed_pos_kernel(e_ref, pe_ref, o_ref, *, scale):
    # Embeddings(x) * sqrt(d_model) + positional encoding (dropout = eval no-op)
    o_ref[...] = e_ref[...] * scale + pe_ref[...]


def embed_pos(emb, pe_t, d_model):
    B, T, D = emb.shape
    tt = _sub_tile(T, 256)
    return pl.pallas_call(
        partial(_embed_pos_kernel, scale=math.sqrt(d_model)),
        out_shape=jax.ShapeDtypeStruct((B, T, D), jnp.float32),
        grid=(B, T // tt),
        in_specs=[pl.BlockSpec((None, tt, D), lambda b, t: (b, t, 0)),
                  pl.BlockSpec((tt, D), lambda b, t: (t, 0))],   # pe broadcast over batch
        out_specs=pl.BlockSpec((None, tt, D), lambda b, t: (b, t, 0)),
        compiler_params=pltpu.CompilerParams(
            dimension_semantics=("parallel", "parallel")),
    )(emb, pe_t)


# ----------------------------------------------------------------------------
# Parameters / model glue
# ----------------------------------------------------------------------------
def positional_encoding(max_len, d_model):
    pos = jnp.arange(max_len, dtype=jnp.float32)[:, None]
    div = jnp.exp(jnp.arange(0, d_model, 2, dtype=jnp.float32)
                  * (-math.log(10000.0) / d_model))
    pe = jnp.zeros((max_len, d_model), jnp.float32)
    pe = pe.at[:, 0::2].set(jnp.sin(pos * div))
    pe = pe.at[:, 1::2].set(jnp.cos(pos * div))
    return pe


def _dense(key, fan_in, fan_out):
    w = jax.random.normal(key, (fan_in, fan_out), jnp.float32) / math.sqrt(fan_in)
    return w.astype(jnp.bfloat16), jnp.zeros((1, fan_out), jnp.float32)


def _ln(d):
    return {"g": jnp.ones((1, d), jnp.float32), "b": jnp.zeros((1, d), jnp.float32)}


def init_params(key, vocab, d_model, d_ff, n_layers):
    keys = jax.random.split(key, 1 + 4 * n_layers + 7 * n_layers)
    ki = iter(keys)
    lut = jax.random.normal(next(ki), (vocab, d_model), jnp.float32) * 0.1
    params = {
        "lut": lut,
        # tied output-projection weight (decoder.proj.weight == lut), stored
        # pre-transposed and in bf16 so the projection kernel streams it directly
        "lut_T": lut.T.astype(jnp.bfloat16),
        "proj_b": jnp.zeros((1, vocab), jnp.float32),
        "enc": [], "dec": [],
        "enc_ln": _ln(d_model), "dec_ln": _ln(d_model),
    }
    for _ in range(n_layers):
        w_qkv, b_qkv = _dense(next(ki), d_model, 3 * d_model)
        w_o, b_o = _dense(next(ki), d_model, d_model)
        w_f1, b_f1 = _dense(next(ki), d_model, d_ff)
        w_f2, b_f2 = _dense(next(ki), d_ff, d_model)
        params["enc"].append({
            "ln1": _ln(d_model), "w_qkv": w_qkv, "b_qkv": b_qkv,
            "w_o": w_o, "b_o": b_o,
            "ln2": _ln(d_model), "w_f1": w_f1, "b_f1": b_f1,
            "w_f2": w_f2, "b_f2": b_f2,
        })
    for _ in range(n_layers):
        w_qkv, b_qkv = _dense(next(ki), d_model, 3 * d_model)
        w_o1, b_o1 = _dense(next(ki), d_model, d_model)
        w_q, b_q = _dense(next(ki), d_model, d_model)
        w_kv, b_kv = _dense(next(ki), d_model, 2 * d_model)
        w_o2, b_o2 = _dense(next(ki), d_model, d_model)
        w_f1, b_f1 = _dense(next(ki), d_model, d_ff)
        w_f2, b_f2 = _dense(next(ki), d_ff, d_model)
        params["dec"].append({
            "ln1": _ln(d_model), "w_qkv": w_qkv, "b_qkv": b_qkv,
            "w_o1": w_o1, "b_o1": b_o1,
            "ln2": _ln(d_model), "w_q": w_q, "b_q": b_q,
            "w_kv": w_kv, "b_kv": b_kv, "w_o2": w_o2, "b_o2": b_o2,
            "ln3": _ln(d_model), "w_f1": w_f1, "b_f1": b_f1,
            "w_f2": w_f2, "b_f2": b_f2,
        })
    return params


def _split_fused_heads(x2d, B, T, n_parts, H):
    N = x2d.shape[1]
    dh = N // (n_parts * H)
    x = x2d.reshape(B, T, n_parts, H, dh).transpose(2, 0, 3, 1, 4)
    return tuple(x[p] for p in range(n_parts))          # each [B, H, T, dh]


def _split_heads(x2d, B, T, H):
    D = x2d.shape[1]
    dh = D // H
    return x2d.reshape(B, T, H, dh).transpose(0, 2, 1, 3)


def _merge_heads(o):
    B, H, T, dh = o.shape
    return o.transpose(0, 2, 1, 3).reshape(B * T, H * dh)


def encoder_layer(x2d, B, T, mask_f, lp, H):
    # self-attention sublayer: pre-LN fused into the fused QKV projection
    qkv = fused_linear(x2d, lp["w_qkv"], lp["b_qkv"],
                       ln=(lp["ln1"]["g"], lp["ln1"]["b"]), out_dtype=jnp.bfloat16)
    q, k, v = _split_fused_heads(qkv, B, T, 3, H)
    o = flash_attention(q, k, v, mask_f)
    x2d = fused_linear(_merge_heads(o), lp["w_o"], lp["b_o"], residual=x2d)
    # feed-forward sublayer: pre-LN + ReLU fused into FF1, residual fused into FF2
    h = fused_linear(x2d, lp["w_f1"], lp["b_f1"],
                     ln=(lp["ln2"]["g"], lp["ln2"]["b"]), relu=True,
                     out_dtype=jnp.bfloat16)
    return fused_linear(h, lp["w_f2"], lp["b_f2"], residual=x2d)


def decoder_layer(x2d, mem2d, B, T, S, src_mask_f, tgt_mask_f, lp, H):
    # masked self-attention
    qkv = fused_linear(x2d, lp["w_qkv"], lp["b_qkv"],
                       ln=(lp["ln1"]["g"], lp["ln1"]["b"]), out_dtype=jnp.bfloat16)
    q, k, v = _split_fused_heads(qkv, B, T, 3, H)
    o = flash_attention(q, k, v, tgt_mask_f)
    x2d = fused_linear(_merge_heads(o), lp["w_o1"], lp["b_o1"], residual=x2d)
    # cross-attention: Q from LN(x); K/V from encoder memory (already normed)
    qc = fused_linear(x2d, lp["w_q"], lp["b_q"],
                      ln=(lp["ln2"]["g"], lp["ln2"]["b"]), out_dtype=jnp.bfloat16)
    kvc = fused_linear(mem2d, lp["w_kv"], lp["b_kv"], out_dtype=jnp.bfloat16)
    q = _split_heads(qc, B, T, H)
    k, v = _split_fused_heads(kvc, B, S, 2, H)
    o = flash_attention(q, k, v, src_mask_f)
    x2d = fused_linear(_merge_heads(o), lp["w_o2"], lp["b_o2"], residual=x2d)
    # feed-forward
    h = fused_linear(x2d, lp["w_f1"], lp["b_f1"],
                     ln=(lp["ln3"]["g"], lp["ln3"]["b"]), relu=True,
                     out_dtype=jnp.bfloat16)
    return fused_linear(h, lp["w_f2"], lp["b_f2"], residual=x2d)


def encode(src, src_mask_f, params, pe, d_model, H):
    B, S = src.shape
    emb = params["lut"][src]                    # embedding gather stays in XLA
    x = embed_pos(emb, pe[:S], d_model)
    x2d = x.reshape(B * S, d_model)
    for lp in params["enc"]:
        x2d = encoder_layer(x2d, B, S, src_mask_f, lp, H)
    return layernorm(x2d, params["enc_ln"]["g"], params["enc_ln"]["b"])


def decode(mem2d, B, S, src_mask_f, tgt, tgt_mask_f, params, pe, d_model, H):
    _, T = tgt.shape
    emb = params["lut"][tgt]
    x = embed_pos(emb, pe[:T], d_model)
    x2d = x.reshape(B * T, d_model)
    for lp in params["dec"]:
        x2d = decoder_layer(x2d, mem2d, B, T, S, src_mask_f, tgt_mask_f, lp, H)
    # final LN fused into the tied output projection + log_softmax
    logp = proj_log_softmax(x2d, (params["dec_ln"]["g"], params["dec_ln"]["b"]),
                            params["lut_T"], params["proj_b"])
    return logp.reshape(B, T, params["lut"].shape[0])


def encoder_decoder_forward(params, src, tgt, src_mask, tgt_mask,
                            *, d_model, n_heads, pe):
    # EncoderDecoder.forward(src, tgt, src_mask, tgt_mask)
    src_mask_f = src_mask.astype(jnp.float32)   # [B, 1, S]
    tgt_mask_f = tgt_mask.astype(jnp.float32)   # [B, T, T]
    B, S = src.shape
    mem2d = encode(src, src_mask_f, params, pe, d_model, n_heads)
    return decode(mem2d, B, S, src_mask_f, tgt, tgt_mask_f,
                  params, pe, d_model, n_heads)
    # TODO(synk): the reference module's constructor-injected decoder also
    # receives `src` (copy mechanism?) and returns a tuple; a standard
    # transformer decoder returning log-probs is implemented here.


# ----------------------------------------------------------------------------
if __name__ == "__main__":
    vocab, d_model, d_ff, n_heads, n_layers = 32, 32, 64, 4, 2
    B, S, T = 2, 8, 8
    # TODO(synk): d_model=32 / head_dim=8 under-fill the 128-lane vregs; in
    # production these dims should be >=128 for full MXU/VPU utilisation.

    key = jax.random.PRNGKey(0)
    kp, ks, kt = jax.random.split(key, 3)
    params = init_params(kp, vocab, d_model, d_ff, n_layers)
    pe = positional_encoding(64, d_model)

    src = jax.random.randint(ks, (B, S), 1, vocab)
    tgt = jax.random.randint(kt, (B, T), 1, vocab)
    src_mask = jnp.ones((B, 1, S), dtype=bool)                                   # pad mask
    tgt_mask = jnp.broadcast_to(jnp.tril(jnp.ones((T, T), bool)), (B, T, T))     # subsequent mask

    fwd = jax.jit(partial(encoder_decoder_forward,
                          d_model=d_model, n_heads=n_heads, pe=pe))
    out = fwd(params, src, tgt, src_mask, tgt_mask)
    jax.block_until_ready(out)

    assert out.shape == (B, T, vocab)
    # sanity: rows are valid log-probability distributions
    assert bool(jnp.allclose(jnp.exp(out).sum(-1), 1.0, atol=1e-3))
    print("KERNEL_OK")
</pallas_src>

<mosaic_0001>
module attributes {stable_mosaic.version = 11 : i64} {
  func.func @_embed_pos_kernel(%arg0: i32, %arg1: i32, %arg2: memref<1x8x32xf32, #tpu.memory_space<vmem>>, %arg3: memref<8x32xf32, #tpu.memory_space<vmem>>, %arg4: memref<1x8x32xf32, #tpu.memory_space<vmem>>) attributes {dimension_semantics = [#tpu.dimension_semantics<parallel>, #tpu.dimension_semantics<parallel>], iteration_bounds = array<i64: 2, 1>, scalar_prefetch = 0 : i64, scratch_operands = 0 : i64, tpu.core_type = #tpu.core_type<tc>, window_params = [{transform_indices = @transform_0, window_bounds = array<i64: 1, 8, 32>}, {transform_indices = @transform_1, window_bounds = array<i64: 8, 32>}, {transform_indices = @transform_2, window_bounds = array<i64: 1, 8, 32>}]} {
    %c0 = arith.constant 0 : index
    %c0_0 = arith.constant 0 : index
    %c0_1 = arith.constant 0 : index
    %0 = vector.load %arg2[%c0, %c0_0, %c0_1] : memref<1x8x32xf32, #tpu.memory_space<vmem>>, vector<1x8x32xf32>
    %1 = vector.shape_cast %0 : vector<1x8x32xf32> to vector<8x32xf32>
    %cst = arith.constant 5.65685415 : f32
    %2 = vector.broadcast %cst : f32 to vector<8x32xf32>
    %3 = arith.mulf %1, %2 : vector<8x32xf32>
    %c0_2 = arith.constant 0 : index
    %c0_3 = arith.constant 0 : index
    %4 = vector.load %arg3[%c0_2, %c0_3] : memref<8x32xf32, #tpu.memory_space<vmem>>, vector<8x32xf32>
    %5 = arith.addf %3, %4 : vector<8x32xf32>
    %c0_4 = arith.constant 0 : index
    %c0_5 = arith.constant 0 : index
    %c0_6 = arith.constant 0 : index
    %6 = vector.load %arg4[%c0_4, %c0_5, %c0_6] : memref<1x8x32xf32, #tpu.memory_space<vmem>>, vector<1x8x32xf32>
    %7 = vector.shape_cast %6 : vector<1x8x32xf32> to vector<8x32xf32>
    %8 = vector.shape_cast %5 : vector<8x32xf32> to vector<1x8x32xf32>
    tpu.vector_store %arg4[%c0_4, %c0_5, %c0_6], %8 {strides = array<i32>} : memref<1x8x32xf32, #tpu.memory_space<vmem>>, vector<1x8x32xf32>,
    return
  }
  func.func @transform_0(%arg0: i32, %arg1: i32) -> (i32, i32, i32) {
    %c0_i32 = arith.constant 0 : i32
    %c0_i32_0 = arith.constant 0 : i32
    return %arg0, %arg1, %c0_i32 : i32, i32, i32
  }
  func.func @transform_1(%arg0: i32, %arg1: i32) -> (i32, i32) {
    %c0_i32 = arith.constant 0 : i32
    %c0_i32_0 = arith.constant 0 : i32
    return %arg1, %c0_i32 : i32, i32
  }
  func.func @transform_2(%arg0: i32, %arg1: i32) -> (i32, i32, i32) {
    %c0_i32 = arith.constant 0 : i32
    %c0_i32_0 = arith.constant 0 : i32
    return %arg0, %arg1, %c0_i32 : i32, i32, i32
  }
}

module attributes {stable_mosaic.version = 11 : i64} {
  func.func @_fused_linear_kernel(%arg0: i32, %arg1: i32, %arg2: memref<16x32xf32, #tpu.memory_space<vmem>>, %arg3: memref<1x32xf32, #tpu.memory_space<vmem>>, %arg4: memref<1x32xf32, #tpu.memory_space<vmem>>, %arg5: memref<32x96xbf16, #tpu.memory_space<vmem>>, %arg6: memref<1x96xf32, #tpu.memory_space<vmem>>, %arg7: memref<16x96xbf16, #tpu.memory_space<vmem>>) attributes {dimension_semantics = [#tpu.dimension_semantics<parallel>, #tpu.dimension_semantics<parallel>], iteration_bounds = array<i64: 1, 1>, scalar_prefetch = 0 : i64, scratch_operands = 0 : i64, tpu.core_type = #tpu.core_type<tc>, window_params = [{transform_indices = @transform_0, window_bounds = array<i64: 16, 32>}, {pipeline_mode = #tpu.pipeline_mode<synchronous>, transform_indices = @transform_1, window_bounds = array<i64: 1, 32>}, {pipeline_mode = #tpu.pipeline_mode<synchronous>, transform_indices = @transform_2, window_bounds = array<i64: 1, 32>}, {transform_indices = @transform_3, window_bounds = array<i64: 32, 96>}, {transform_indices = @transform_4, window_bounds = array<i64: 1, 96>}, {transform_indices = @transform_5, window_bounds = array<i64: 16, 96>}]} {
    %c0 = arith.constant 0 : index
    %c0_0 = arith.constant 0 : index
    %0 = vector.load %arg2[%c0, %c0_0] : memref<16x32xf32, #tpu.memory_space<vmem>>, vector<16x32xf32>
    %cst = arith.constant dense<0.000000e+00> : vector<16xf32>
    %1 = vector.multi_reduction <add>, %0, %cst [1] : vector<16x32xf32> to vector<16xf32>
    %2 = vector.shape_cast %1 : vector<16xf32> to vector<16x1xf32>
    %cst_1 = arith.constant 3.200000e+01 : f32
    %3 = vector.broadcast %cst_1 : f32 to vector<16x1xf32>
    %4 = arith.divf %2, %3 : vector<16x1xf32>
    %5 = vector.broadcast %4 : vector<16x1xf32> to vector<16x32xf32>
    %6 = arith.subf %0, %5 : vector<16x32xf32>
    %7 = arith.mulf %6, %6 : vector<16x32xf32>
    %cst_2 = arith.constant dense<0.000000e+00> : vector<16xf32>
    %8 = vector.multi_reduction <add>, %7, %cst_2 [1] : vector<16x32xf32> to vector<16xf32>
    %9 = vector.shape_cast %8 : vector<16xf32> to vector<16x1xf32>
    %cst_3 = arith.constant 3.200000e+01 : f32
    %10 = vector.broadcast %cst_3 : f32 to vector<16x1xf32>
    %11 = arith.divf %9, %10 : vector<16x1xf32>
    %cst_4 = arith.constant 9.99999997E-7 : f32
    %12 = vector.broadcast %cst_4 : f32 to vector<16x1xf32>
    %13 = arith.addf %11, %12 : vector<16x1xf32>
    %14 = math.rsqrt %13 : vector<16x1xf32>
    %15 = vector.broadcast %14 : vector<16x1xf32> to vector<16x32xf32>
    %16 = arith.mulf %6, %15 : vector<16x32xf32>
    %c0_5 = arith.constant 0 : index
    %c0_6 = arith.constant 0 : index
    %17 = vector.load %arg3[%c0_5, %c0_6] : memref<1x32xf32, #tpu.memory_space<vmem>>, vector<1x32xf32>
    %18 = vector.broadcast %17 : vector<1x32xf32> to vector<16x32xf32>
    %19 = arith.mulf %16, %18 : vector<16x32xf32>
    %c0_7 = arith.constant 0 : index
    %c0_8 = arith.constant 0 : index
    %20 = vector.load %arg4[%c0_7, %c0_8] : memref<1x32xf32, #tpu.memory_space<vmem>>, vector<1x32xf32>
    %21 = vector.broadcast %20 : vector<1x32xf32> to vector<16x32xf32>
    %22 = arith.addf %19, %21 : vector<16x32xf32>
    %23 = arith.truncf %22 : vector<16x32xf32> to vector<16x32xbf16>
    %c0_9 = arith.constant 0 : index
    %c0_10 = arith.constant 0 : index
    %24 = vector.load %arg5[%c0_9, %c0_10] : memref<32x96xbf16, #tpu.memory_space<vmem>>, vector<32x96xbf16>
    %cst_11 = arith.constant dense<0.000000e+00> : vector<16x96xf32>
    %25 = tpu.matmul %23, %24, %cst_11 {dimension_numbers = #tpu.dot_dimension_numbers<[1], [0], [0], [1], [0, 0, 1, 1], [], []>} : vector<16x32xbf16>, vector<32x96xbf16>, vector<16x96xf32> -> vector<16x96xf32>
    %c0_12 = arith.constant 0 : index
    %c0_13 = arith.constant 0 : index
    %26 = vector.load %arg6[%c0_12, %c0_13] : memref<1x96xf32, #tpu.memory_space<vmem>>, vector<1x96xf32>
    %27 = vector.broadcast %26 : vector<1x96xf32> to vector<16x96xf32>
    %28 = arith.addf %25, %27 : vector<16x96xf32>
    %29 = arith.truncf %28 : vector<16x96xf32> to vector<16x96xbf16>
    %c0_14 = arith.constant 0 : index
    %c0_15 = arith.constant 0 : index
    %30 = vector.load %arg7[%c0_14, %c0_15] : memref<16x96xbf16, #tpu.memory_space<vmem>>, vector<16x96xbf16>
    tpu.vector_store %arg7[%c0_14, %c0_15], %29 {strides = array<i32>} : memref<16x96xbf16, #tpu.memory_space<vmem>>, vector<16x96xbf16>,
    return
  }
  func.func @transform_0(%arg0: i32, %arg1: i32) -> (i32, i32) {
    %c0_i32 = arith.constant 0 : i32
    %c0_i32_0 = arith.constant 0 : i32
    return %arg0, %c0_i32 : i32, i32
  }
  func.func @transform_1(%arg0: i32, %arg1: i32) -> (i32, i32) {
    %c0_i32 = arith.constant 0 : i32
    %c0_i32_0 = arith.constant 0 : i32
    %c0_i32_1 = arith.constant 0 : i32
    return %c0_i32, %c0_i32_0 : i32, i32
  }
  func.func @transform_2(%arg0: i32, %arg1: i32) -> (i32, i32) {
    %c0_i32 = arith.constant 0 : i32
    %c0_i32_0 = arith.constant 0 : i32
    %c0_i32_1 = arith.constant 0 : i32
    return %c0_i32, %c0_i32_0 : i32, i32
  }
  func.func @transform_3(%arg0: i32, %arg1: i32) -> (i32, i32) {
    %c0_i32 = arith.constant 0 : i32
    %c0_i32_0 = arith.constant 0 : i32
    return %c0_i32, %arg1 : i32, i32
  }
  func.func @transform_4(%arg0: i32, %arg1: i32) -> (i32, i32) {
    %c0_i32 = arith.constant 0 : i32
    %c0_i32_0 = arith.constant 0 : i32
    return %c0_i32, %arg1 : i32, i32
  }
  func.func @transform_5(%arg0: i32, %arg1: i32) -> (i32, i32) {
    %c0_i32 = arith.constant 0 : i32
    return %arg0, %arg1 : i32, i32
  }
}

module attributes {stable_mosaic.version = 11 : i64} {
  func.func @_flash_attn_kernel(%arg0: i32, %arg1: i32, %arg2: i32, %arg3: memref<1x8x8xf32, #tpu.memory_space<vmem>>, %arg4: memref<1x1x8x8xbf16, #tpu.memory_space<vmem>>, %arg5: memref<1x1x8x8xbf16, #tpu.memory_space<vmem>>, %arg6: memref<1x1x8x8xbf16, #tpu.memory_space<vmem>>, %arg7: memref<1x1x8x8xbf16, #tpu.memory_space<vmem>>, %arg8: memref<8x1xf32, #tpu.memory_space<vmem>>, %arg9: memref<8x1xf32, #tpu.memory_space<vmem>>, %arg10: memref<8x8xf32, #tpu.memory_space<vmem>>) attributes {dimension_semantics = [#tpu.dimension_semantics<parallel>, #tpu.dimension_semantics<parallel>, #tpu.dimension_semantics<arbitrary>], iteration_bounds = array<i64: 2, 4, 1>, scalar_prefetch = 0 : i64, scratch_operands = 3 : i64, tpu.core_type = #tpu.core_type<tc>, window_params = [{transform_indices = @transform_0, window_bounds = array<i64: 1, 8, 8>}, {transform_indices = @transform_1, window_bounds = array<i64: 1, 1, 8, 8>}, {transform_indices = @transform_2, window_bounds = array<i64: 1, 1, 8, 8>}, {transform_indices = @transform_3, window_bounds = array<i64: 1, 1, 8, 8>}, {transform_indices = @transform_4, window_bounds = array<i64: 1, 1, 8, 8>}]} {
    %c0_i32 = arith.constant 0 : i32
    %0 = arith.cmpi eq, %arg2, %c0_i32 : i32
    %1 = arith.extui %0 : i1 to i32
    %c0_i32_0 = arith.constant 0 : i32
    %2 = arith.cmpi ne, %1, %c0_i32_0 : i32
    scf.if %2 {
      %cst_35 = arith.constant 0xFF800000 : f32
      %44 = vector.broadcast %cst_35 : f32 to vector<8x1xf32>
      %c0_36 = arith.constant 0 : index
      %c0_37 = arith.constant 0 : index
      %45 = vector.load %arg8[%c0_36, %c0_37] : memref<8x1xf32, #tpu.memory_space<vmem>>, vector<8x1xf32>
      tpu.vector_store %arg8[%c0_36, %c0_37], %44 {strides = array<i32>} : memref<8x1xf32, #tpu.memory_space<vmem>>, vector<8x1xf32>,
      %cst_38 = arith.constant 0.000000e+00 : f32
      %46 = vector.broadcast %cst_38 : f32 to vector<8x1xf32>
      %c0_39 = arith.constant 0 : index
      %c0_40 = arith.constant 0 : index
      %47 = vector.load %arg9[%c0_39, %c0_40] : memref<8x1xf32, #tpu.memory_space<vmem>>, vector<8x1xf32>
      tpu.vector_store %arg9[%c0_39, %c0_40], %46 {strides = array<i32>} : memref<8x1xf32, #tpu.memory_space<vmem>>, vector<8x1xf32>,
      %cst_41 = arith.constant 0.000000e+00 : f32
      %48 = vector.broadcast %cst_41 : f32 to vector<8x8xf32>
      %c0_42 = arith.constant 0 : index
      %c0_43 = arith.constant 0 : index
      %49 = vector.load %arg10[%c0_42, %c0_43] : memref<8x8xf32, #tpu.memory_space<vmem>>, vector<8x8xf32>
      tpu.vector_store %arg10[%c0_42, %c0_43], %48 {strides = array<i32>} : memref<8x8xf32, #tpu.memory_space<vmem>>, vector<8x8xf32>,
    } else {
    }
    %c0 = arith.constant 0 : index
    %c0_1 = arith.constant 0 : index
    %c0_2 = arith.constant 0 : index
    %c0_3 = arith.constant 0 : index
    %3 = vector.load %arg4[%c0, %c0_1, %c0_2, %c0_3] : memref<1x1x8x8xbf16, #tpu.memory_space<vmem>>, vector<1x1x8x8xbf16>
    %4 = vector.shape_cast %3 : vector<1x1x8x8xbf16> to vector<8x8xbf16>
    %c0_4 = arith.constant 0 : index
    %c0_5 = arith.constant 0 : index
    %c0_6 = arith.constant 0 : index
    %c0_7 = arith.constant 0 : index
    %5 = vector.load %arg5[%c0_4, %c0_5, %c0_6, %c0_7] : memref<1x1x8x8xbf16, #tpu.memory_space<vmem>>, vector<1x1x8x8xbf16>
    %6 = vector.shape_cast %5 : vector<1x1x8x8xbf16> to vector<8x8xbf16>
    %cst = arith.constant dense<0.000000e+00> : vector<8x8xf32>
    %7 = tpu.matmul %4, %6, %cst {dimension_numbers = #tpu.dot_dimension_numbers<[1], [1], [0], [0], [0, 0, 1, 0], [], []>} : vector<8x8xbf16>, vector<8x8xbf16>, vector<8x8xf32> -> vector<8x8xf32>
    %cst_8 = arith.constant 0.353553385 : f32
    %8 = vector.broadcast %cst_8 : f32 to vector<8x8xf32>
    %9 = arith.mulf %7, %8 : vector<8x8xf32>
    %c0_9 = arith.constant 0 : index
    %c0_10 = arith.constant 0 : index
    %c0_11 = arith.constant 0 : index
    %10 = vector.load %arg3[%c0_9, %c0_10, %c0_11] : memref<1x8x8xf32, #tpu.memory_space<vmem>>, vector<1x8x8xf32>
    %11 = vector.shape_cast %10 : vector<1x8x8xf32> to vector<8x8xf32>
    %cst_12 = arith.constant 0.000000e+00 : f32
    %12 = vector.broadcast %cst_12 : f32 to vector<8x8xf32>
    %13 = arith.cmpf ogt, %11, %12 : vector<8x8xf32>
    %cst_13 = arith.constant -1.000000e+09 : f32
    %14 = vector.broadcast %cst_13 : f32 to vector<8x8xf32>
    %15 = arith.select %13, %9, %14 : vector<8x8xi1>, vector<8x8xf32>
    %c0_14 = arith.constant 0 : index
    %c0_15 = arith.constant 0 : index
    %16 = vector.load %arg8[%c0_14, %c0_15] : memref<8x1xf32, #tpu.memory_space<vmem>>, vector<8x1xf32>
    %cst_16 = arith.constant dense<0xFF800000> : vector<8xf32>
    %17 = vector.multi_reduction <maximumf>, %15, %cst_16 [1] : vector<8x8xf32> to vector<8xf32>
    %18 = vector.shape_cast %17 : vector<8xf32> to vector<8x1xf32>
    %19 = arith.maximumf %16, %18 : vector<8x1xf32>
    %20 = arith.subf %16, %19 : vector<8x1xf32>
    %21 = math.exp %20 : vector<8x1xf32>
    %22 = vector.broadcast %19 : vector<8x1xf32> to vector<8x8xf32>
    %23 = arith.subf %15, %22 : vector<8x8xf32>
    %24 = math.exp %23 : vector<8x8xf32>
    %c0_17 = arith.constant 0 : index
    %c0_18 = arith.constant 0 : index
    %25 = vector.load %arg9[%c0_17, %c0_18] : memref<8x1xf32, #tpu.memory_space<vmem>>, vector<8x1xf32>
    %26 = arith.mulf %21, %25 : vector<8x1xf32>
    %cst_19 = arith.constant dense<0.000000e+00> : vector<8xf32>
    %27 = vector.multi_reduction <add>, %24, %cst_19 [1] : vector<8x8xf32> to vector<8xf32>
    %28 = vector.shape_cast %27 : vector<8xf32> to vector<8x1xf32>
    %29 = arith.addf %26, %28 : vector<8x1xf32>
    %c0_20 = arith.constant 0 : index
    %c0_21 = arith.constant 0 : index
    %30 = vector.load %arg9[%c0_20, %c0_21] : memref<8x1xf32, #tpu.memory_space<vmem>>, vector<8x1xf32>
    tpu.vector_store %arg9[%c0_20, %c0_21], %29 {strides = array<i32>} : memref<8x1xf32, #tpu.memory_space<vmem>>, vector<8x1xf32>,
    %c0_22 = arith.constant 0 : index
    %c0_23 = arith.constant 0 : index
    %31 = vector.load %arg10[%c0_22, %c0_23] : memref<8x8xf32, #tpu.memory_space<vmem>>, vector<8x8xf32>
    %32 = vector.broadcast %21 : vector<8x1xf32> to vector<8x8xf32>
    %33 = arith.mulf %32, %31 : vector<8x8xf32>
    %34 = arith.truncf %24 : vector<8x8xf32> to vector<8x8xbf16>
    %c0_24 = arith.constant 0 : index
    %c0_25 = arith.constant 0 : index
    %c0_26 = arith.constant 0 : index
    %c0_27 = arith.constant 0 : index
    %35 = vector.load %arg6[%c0_24, %c0_25, %c0_26, %c0_27] : memref<1x1x8x8xbf16, #tpu.memory_space<vmem>>, vector<1x1x8x8xbf16>
    %36 = vector.shape_cast %35 : vector<1x1x8x8xbf16> to vector<8x8xbf16>
    %cst_28 = arith.constant dense<0.000000e+00> : vector<8x8xf32>
    %37 = tpu.matmul %34, %36, %cst_28 {dimension_numbers = #tpu.dot_dimension_numbers<[1], [0], [0], [1], [0, 0, 1, 1], [], []>} : vector<8x8xbf16>, vector<8x8xbf16>, vector<8x8xf32> -> vector<8x8xf32>
    %38 = arith.addf %33, %37 : vector<8x8xf32>
    %c0_29 = arith.constant 0 : index
    %c0_30 = arith.constant 0 : index
    %39 = vector.load %arg10[%c0_29, %c0_30] : memref<8x8xf32, #tpu.memory_space<vmem>>, vector<8x8xf32>
    tpu.vector_store %arg10[%c0_29, %c0_30], %38 {strides = array<i32>} : memref<8x8xf32, #tpu.memory_space<vmem>>, vector<8x8xf32>,
    %c0_31 = arith.constant 0 : index
    %c0_32 = arith.constant 0 : index
    %40 = vector.load %arg8[%c0_31, %c0_32] : memref<8x1xf32, #tpu.memory_space<vmem>>, vector<8x1xf32>
    tpu.vector_store %arg8[%c0_31, %c0_32], %19 {strides = array<i32>} : memref<8x1xf32, #tpu.memory_space<vmem>>, vector<8x1xf32>,
    %c0_i32_33 = arith.constant 0 : i32
    %41 = arith.cmpi eq, %arg2, %c0_i32_33 : i32
    %42 = arith.extui %41 : i1 to i32
    %c0_i32_34 = arith.constant 0 : i32
    %43 = arith.cmpi ne, %42, %c0_i32_34 : i32
    scf.if %43 {
      %c0_35 = arith.constant 0 : index
      %c0_36 = arith.constant 0 : index
      %44 = vector.load %arg10[%c0_35, %c0_36] : memref<8x8xf32, #tpu.memory_space<vmem>>, vector<8x8xf32>
      %c0_37 = arith.constant 0 : index
      %c0_38 = arith.constant 0 : index
      %45 = vector.load %arg9[%c0_37, %c0_38] : memref<8x1xf32, #tpu.memory_space<vmem>>, vector<8x1xf32>
      %46 = tpu.reciprocal %45 {approx = true} : vector<8x1xf32> -> vector<8x1xf32>
      %47 = vector.broadcast %46 : vector<8x1xf32> to vector<8x8xf32>
      %48 = arith.mulf %44, %47 : vector<8x8xf32>
      %49 = arith.truncf %48 : vector<8x8xf32> to vector<8x8xbf16>
      %c0_39 = arith.constant 0 : index
      %c0_40 = arith.constant 0 : index
      %c0_41 = arith.constant 0 : index
      %c0_42 = arith.constant 0 : index
      %50 = vector.load %arg7[%c0_39, %c0_40, %c0_41, %c0_42] : memref<1x1x8x8xbf16, #tpu.memory_space<vmem>>, vector<1x1x8x8xbf16>
      %51 = vector.shape_cast %50 : vector<1x1x8x8xbf16> to vector<8x8xbf16>
      %52 = vector.shape_cast %49 : vector<8x8xbf16> to vector<1x1x8x8xbf16>
      tpu.vector_store %arg7[%c0_39, %c0_40, %c0_41, %c0_42], %52 {strides = array<i32>} : memref<1x1x8x8xbf16, #tpu.memory_space<vmem>>, vector<1x1x8x8xbf16>,
    } else {
    }
    return
  }
  func.func @transform_0(%arg0: i32, %arg1: i32, %arg2: i32) -> (i32, i32, i32) {
    %c0_i32 = arith.constant 0 : i32
    %c0_i32_0 = arith.constant 0 : i32
    return %arg0, %c0_i32, %arg2 : i32, i32, i32
  }
  func.func @transform_1(%arg0: i32, %arg1: i32, %arg2: i32) -> (i32, i32, i32, i32) {
    %c0_i32 = arith.constant 0 : i32
    %c0_i32_0 = arith.constant 0 : i32
    %c0_i32_1 = arith.constant 0 : i32
    return %arg0, %arg1, %c0_i32, %c0_i32_0 : i32, i32, i32, i32
  }
  func.func @transform_2(%arg0: i32, %arg1: i32, %arg2: i32) -> (i32, i32, i32, i32) {
    %c0_i32 = arith.constant 0 : i32
    %c0_i32_0 = arith.constant 0 : i32
    return %arg0, %arg1, %arg2, %c0_i32 : i32, i32, i32, i32
  }
  func.func @transform_3(%arg0: i32, %arg1: i32, %arg2: i32) -> (i32, i32, i32, i32) {
    %c0_i32 = arith.constant 0 : i32
    %c0_i32_0 = arith.constant 0 : i32
    return %arg0, %arg1, %arg2, %c0_i32 : i32, i32, i32, i32
  }
  func.func @transform_4(%arg0: i32, %arg1: i32, %arg2: i32) -> (i32, i32, i32, i32) {
    %c0_i32 = arith.constant 0 : i32
    %c0_i32_0 = arith.constant 0 : i32
    %c0_i32_1 = arith.constant 0 : i32
    return %arg0, %arg1, %c0_i32, %c0_i32_0 : i32, i32, i32, i32
  }
}

module attributes {stable_mosaic.version = 11 : i64} {
  func.func @_fused_linear_kernel(%arg0: i32, %arg1: i32, %arg2: memref<16x32xbf16, #tpu.memory_space<vmem>>, %arg3: memref<32x32xbf16, #tpu.memory_space<vmem>>, %arg4: memref<1x32xf32, #tpu.memory_space<vmem>>, %arg5: memref<16x32xf32, #tpu.memory_space<vmem>>, %arg6: memref<16x32xf32, #tpu.memory_space<vmem>>) attributes {dimension_semantics = [#tpu.dimension_semantics<parallel>, #tpu.dimension_semantics<parallel>], iteration_bounds = array<i64: 1, 1>, scalar_prefetch = 0 : i64, scratch_operands = 0 : i64, tpu.core_type = #tpu.core_type<tc>, window_params = [{transform_indices = @transform_0, window_bounds = array<i64: 16, 32>}, {transform_indices = @transform_1, window_bounds = array<i64: 32, 32>}, {transform_indices = @transform_2, window_bounds = array<i64: 1, 32>}, {transform_indices = @transform_3, window_bounds = array<i64: 16, 32>}, {transform_indices = @transform_4, window_bounds = array<i64: 16, 32>}]} {
    %c0 = arith.constant 0 : index
    %c0_0 = arith.constant 0 : index
    %0 = vector.load %arg2[%c0, %c0_0] : memref<16x32xbf16, #tpu.memory_space<vmem>>, vector<16x32xbf16>
    %c0_1 = arith.constant 0 : index
    %c0_2 = arith.constant 0 : index
    %1 = vector.load %arg3[%c0_1, %c0_2] : memref<32x32xbf16, #tpu.memory_space<vmem>>, vector<32x32xbf16>
    %cst = arith.constant dense<0.000000e+00> : vector<16x32xf32>
    %2 = tpu.matmul %0, %1, %cst {dimension_numbers = #tpu.dot_dimension_numbers<[1], [0], [0], [1], [0, 0, 1, 1], [], []>} : vector<16x32xbf16>, vector<32x32xbf16>, vector<16x32xf32> -> vector<16x32xf32>
    %c0_3 = arith.constant 0 : index
    %c0_4 = arith.constant 0 : index
    %3 = vector.load %arg4[%c0_3, %c0_4] : memref<1x32xf32, #tpu.memory_space<vmem>>, vector<1x32xf32>
    %4 = vector.broadcast %3 : vector<1x32xf32> to vector<16x32xf32>
    %5 = arith.addf %2, %4 : vector<16x32xf32>
    %c0_5 = arith.constant 0 : index
    %c0_6 = arith.constant 0 : index
    %6 = vector.load %arg5[%c0_5, %c0_6] : memref<16x32xf32, #tpu.memory_space<vmem>>, vector<16x32xf32>
    %7 = arith.addf %5, %6 : vector<16x32xf32>
    %c0_7 = arith.constant 0 : index
    %c0_8 = arith.constant 0 : index
    %8 = vector.load %arg6[%c0_7, %c0_8] : memref<16x32xf32, #tpu.memory_space<vmem>>, vector<16x32xf32>
    tpu.vector_store %arg6[%c0_7, %c0_8], %7 {strides = array<i32>} : memref<16x32xf32, #tpu.memory_space<vmem>>, vector<16x32xf32>,
    return
  }
  func.func @transform_0(%arg0: i32, %arg1: i32) -> (i32, i32) {
    %c0_i32 = arith.constant 0 : i32
    %c0_i32_0 = arith.constant 0 : i32
    return %arg0, %c0_i32 : i32, i32
  }
  func.func @transform_1(%arg0: i32, %arg1: i32) -> (i32, i32) {
    %c0_i32 = arith.constant 0 : i32
    %c0_i32_0 = arith.constant 0 : i32
    return %c0_i32, %arg1 : i32, i32
  }
  func.func @transform_2(%arg0: i32, %arg1: i32) -> (i32, i32) {
    %c0_i32 = arith.constant 0 : i32
    %c0_i32_0 = arith.constant 0 : i32
    return %c0_i32, %arg1 : i32, i32
  }
  func.func @transform_3(%arg0: i32, %arg1: i32) -> (i32, i32) {
    %c0_i32 = arith.constant 0 : i32
    return %arg0, %arg1 : i32, i32
  }
  func.func @transform_4(%arg0: i32, %arg1: i32) -> (i32, i32) {
    %c0_i32 = arith.constant 0 : i32
    return %arg0, %arg1 : i32, i32
  }
}

module attributes {stable_mosaic.version = 11 : i64} {
  func.func @_fused_linear_kernel(%arg0: i32, %arg1: i32, %arg2: memref<16x32xf32, #tpu.memory_space<vmem>>, %arg3: memref<1x32xf32, #tpu.memory_space<vmem>>, %arg4: memref<1x32xf32, #tpu.memory_space<vmem>>, %arg5: memref<32x32xbf16, #tpu.memory_space<vmem>>, %arg6: memref<1x32xf32, #tpu.memory_space<vmem>>, %arg7: memref<16x32xbf16, #tpu.memory_space<vmem>>) attributes {dimension_semantics = [#tpu.dimension_semantics<parallel>, #tpu.dimension_semantics<parallel>], iteration_bounds = array<i64: 1, 1>, scalar_prefetch = 0 : i64, scratch_operands = 0 : i64, tpu.core_type = #tpu.core_type<tc>, window_params = [{transform_indices = @transform_0, window_bounds = array<i64: 16, 32>}, {pipeline_mode = #tpu.pipeline_mode<synchronous>, transform_indices = @transform_1, window_bounds = array<i64: 1, 32>}, {pipeline_mode = #tpu.pipeline_mode<synchronous>, transform_indices = @transform_2, window_bounds = array<i64: 1, 32>}, {transform_indices = @transform_3, window_bounds = array<i64: 32, 32>}, {transform_indices = @transform_4, window_bounds = array<i64: 1, 32>}, {transform_indices = @transform_5, window_bounds = array<i64: 16, 32>}]} {
    %c0 = arith.constant 0 : index
    %c0_0 = arith.constant 0 : index
    %0 = vector.load %arg2[%c0, %c0_0] : memref<16x32xf32, #tpu.memory_space<vmem>>, vector<16x32xf32>
    %cst = arith.constant dense<0.000000e+00> : vector<16xf32>
    %1 = vector.multi_reduction <add>, %0, %cst [1] : vector<16x32xf32> to vector<16xf32>
    %2 = vector.shape_cast %1 : vector<16xf32> to vector<16x1xf32>
    %cst_1 = arith.constant 3.200000e+01 : f32
    %3 = vector.broadcast %cst_1 : f32 to vector<16x1xf32>
    %4 = arith.divf %2, %3 : vector<16x1xf32>
    %5 = vector.broadcast %4 : vector<16x1xf32> to vector<16x32xf32>
    %6 = arith.subf %0, %5 : vector<16x32xf32>
    %7 = arith.mulf %6, %6 : vector<16x32xf32>
    %cst_2 = arith.constant dense<0.000000e+00> : vector<16xf32>
    %8 = vector.multi_reduction <add>, %7, %cst_2 [1] : vector<16x32xf32> to vector<16xf32>
    %9 = vector.shape_cast %8 : vector<16xf32> to vector<16x1xf32>
    %cst_3 = arith.constant 3.200000e+01 : f32
    %10 = vector.broadcast %cst_3 : f32 to vector<16x1xf32>
    %11 = arith.divf %9, %10 : vector<16x1xf32>
    %cst_4 = arith.constant 9.99999997E-7 : f32
    %12 = vector.broadcast %cst_4 : f32 to vector<16x1xf32>
    %13 = arith.addf %11, %12 : vector<16x1xf32>
    %14 = math.rsqrt %13 : vector<16x1xf32>
    %15 = vector.broadcast %14 : vector<16x1xf32> to vector<16x32xf32>
    %16 = arith.mulf %6, %15 : vector<16x32xf32>
    %c0_5 = arith.constant 0 : index
    %c0_6 = arith.constant 0 : index
    %17 = vector.load %arg3[%c0_5, %c0_6] : memref<1x32xf32, #tpu.memory_space<vmem>>, vector<1x32xf32>
    %18 = vector.broadcast %17 : vector<1x32xf32> to vector<16x32xf32>
    %19 = arith.mulf %16, %18 : vector<16x32xf32>
    %c0_7 = arith.constant 0 : index
    %c0_8 = arith.constant 0 : index
    %20 = vector.load %arg4[%c0_7, %c0_8] : memref<1x32xf32, #tpu.memory_space<vmem>>, vector<1x32xf32>
    %21 = vector.broadcast %20 : vector<1x32xf32> to vector<16x32xf32>
    %22 = arith.addf %19, %21 : vector<16x32xf32>
    %23 = arith.truncf %22 : vector<16x32xf32> to vector<16x32xbf16>
    %c0_9 = arith.constant 0 : index
    %c0_10 = arith.constant 0 : index
    %24 = vector.load %arg5[%c0_9, %c0_10] : memref<32x32xbf16, #tpu.memory_space<vmem>>, vector<32x32xbf16>
    %cst_11 = arith.constant dense<0.000000e+00> : vector<16x32xf32>
    %25 = tpu.matmul %23, %24, %cst_11 {dimension_numbers = #tpu.dot_dimension_numbers<[1], [0], [0], [1], [0, 0, 1, 1], [], []>} : vector<16x32xbf16>, vector<32x32xbf16>, vector<16x32xf32> -> vector<16x32xf32>
    %c0_12 = arith.constant 0 : index
    %c0_13 = arith.constant 0 : index
    %26 = vector.load %arg6[%c0_12, %c0_13] : memref<1x32xf32, #tpu.memory_space<vmem>>, vector<1x32xf32>
    %27 = vector.broadcast %26 : vector<1x32xf32> to vector<16x32xf32>
    %28 = arith.addf %25, %27 : vector<16x32xf32>
    %29 = arith.truncf %28 : vector<16x32xf32> to vector<16x32xbf16>
    %c0_14 = arith.constant 0 : index
    %c0_15 = arith.constant 0 : index
    %30 = vector.load %arg7[%c0_14, %c0_15] : memref<16x32xbf16, #tpu.memory_space<vmem>>, vector<16x32xbf16>
    tpu.vector_store %arg7[%c0_14, %c0_15], %29 {strides = array<i32>} : memref<16x32xbf16, #tpu.memory_space<vmem>>, vector<16x32xbf16>,
    return
  }
  func.func @transform_0(%arg0: i32, %arg1: i32) -> (i32, i32) {
    %c0_i32 = arith.constant 0 : i32
    %c0_i32_0 = arith.constant 0 : i32
    return %arg0, %c0_i32 : i32, i32
  }
  func.func @transform_1(%arg0: i32, %arg1: i32) -> (i32, i32) {
    %c0_i32 = arith.constant 0 : i32
    %c0_i32_0 = arith.constant 0 : i32
    %c0_i32_1 = arith.constant 0 : i32
    return %c0_i32, %c0_i32_0 : i32, i32
  }
  func.func @transform_2(%arg0: i32, %arg1: i32) -> (i32, i32) {
    %c0_i32 = arith.constant 0 : i32
    %c0_i32_0 = arith.constant 0 : i32
    %c0_i32_1 = arith.constant 0 : i32
    return %c0_i32, %c0_i32_0 : i32, i32
  }
  func.func @transform_3(%arg0: i32, %arg1: i32) -> (i32, i32) {
    %c0_i32 = arith.constant 0 : i32
    %c0_i32_0 = arith.constant 0 : i32
    return %c0_i32, %arg1 : i32, i32
  }
  func.func @transform_4(%arg0: i32, %arg1: i32) -> (i32, i32) {
    %c0_i32 = arith.constant 0 : i32
    %c0_i32_0 = arith.constant 0 : i32
    return %c0_i32, %arg1 : i32, i32
  }
  func.func @transform_5(%arg0: i32, %arg1: i32) -> (i32, i32) {
    %c0_i32 = arith.constant 0 : i32
    return %arg0, %arg1 : i32, i32
  }
}

module attributes {stable_mosaic.version = 11 : i64} {
  func.func @_flash_attn_kernel(%arg0: i32, %arg1: i32, %arg2: i32, %arg3: memref<1x1x8xf32, #tpu.memory_space<vmem>>, %arg4: memref<1x1x8x8xbf16, #tpu.memory_space<vmem>>, %arg5: memref<1x1x8x8xbf16, #tpu.memory_space<vmem>>, %arg6: memref<1x1x8x8xbf16, #tpu.memory_space<vmem>>, %arg7: memref<1x1x8x8xbf16, #tpu.memory_space<vmem>>, %arg8: memref<8x1xf32, #tpu.memory_space<vmem>>, %arg9: memref<8x1xf32, #tpu.memory_space<vmem>>, %arg10: memref<8x8xf32, #tpu.memory_space<vmem>>) attributes {dimension_semantics = [#tpu.dimension_semantics<parallel>, #tpu.dimension_semantics<parallel>, #tpu.dimension_semantics<arbitrary>], iteration_bounds = array<i64: 2, 4, 1>, scalar_prefetch = 0 : i64, scratch_operands = 3 : i64, tpu.core_type = #tpu.core_type<tc>, window_params = [{transform_indices = @transform_0, window_bounds = array<i64: 1, 1, 8>}, {transform_indices = @transform_1, window_bounds = array<i64: 1, 1, 8, 8>}, {transform_indices = @transform_2, window_bounds = array<i64: 1, 1, 8, 8>}, {transform_indices = @transform_3, window_bounds = array<i64: 1, 1, 8, 8>}, {transform_indices = @transform_4, window_bounds = array<i64: 1, 1, 8, 8>}]} {
    %c0_i32 = arith.constant 0 : i32
    %0 = arith.cmpi eq, %arg2, %c0_i32 : i32
    %1 = arith.extui %0 : i1 to i32
    %c0_i32_0 = arith.constant 0 : i32
    %2 = arith.cmpi ne, %1, %c0_i32_0 : i32
    scf.if %2 {
      %cst_35 = arith.constant 0xFF800000 : f32
      %46 = vector.broadcast %cst_35 : f32 to vector<8x1xf32>
      %c0_36 = arith.constant 0 : index
      %c0_37 = arith.constant 0 : index
      %47 = vector.load %arg8[%c0_36, %c0_37] : memref<8x1xf32, #tpu.memory_space<vmem>>, vector<8x1xf32>
      tpu.vector_store %arg8[%c0_36, %c0_37], %46 {strides = array<i32>} : memref<8x1xf32, #tpu.memory_space<vmem>>, vector<8x1xf32>,
      %cst_38 = arith.constant 0.000000e+00 : f32
      %48 = vector.broadcast %cst_38 : f32 to vector<8x1xf32>
      %c0_39 = arith.constant 0 : index
      %c0_40 = arith.constant 0 : index
      %49 = vector.load %arg9[%c0_39, %c0_40] : memref<8x1xf32, #tpu.memory_space<vmem>>, vector<8x1xf32>
      tpu.vector_store %arg9[%c0_39, %c0_40], %48 {strides = array<i32>} : memref<8x1xf32, #tpu.memory_space<vmem>>, vector<8x1xf32>,
      %cst_41 = arith.constant 0.000000e+00 : f32
      %50 = vector.broadcast %cst_41 : f32 to vector<8x8xf32>
      %c0_42 = arith.constant 0 : index
      %c0_43 = arith.constant 0 : index
      %51 = vector.load %arg10[%c0_42, %c0_43] : memref<8x8xf32, #tpu.memory_space<vmem>>, vector<8x8xf32>
      tpu.vector_store %arg10[%c0_42, %c0_43], %50 {strides = array<i32>} : memref<8x8xf32, #tpu.memory_space<vmem>>, vector<8x8xf32>,
    } else {
    }
    %c0 = arith.constant 0 : index
    %c0_1 = arith.constant 0 : index
    %c0_2 = arith.constant 0 : index
    %c0_3 = arith.constant 0 : index
    %3 = vector.load %arg4[%c0, %c0_1, %c0_2, %c0_3] : memref<1x1x8x8xbf16, #tpu.memory_space<vmem>>, vector<1x1x8x8xbf16>
    %4 = vector.shape_cast %3 : vector<1x1x8x8xbf16> to vector<8x8xbf16>
    %c0_4 = arith.constant 0 : index
    %c0_5 = arith.constant 0 : index
    %c0_6 = arith.constant 0 : index
    %c0_7 = arith.constant 0 : index
    %5 = vector.load %arg5[%c0_4, %c0_5, %c0_6, %c0_7] : memref<1x1x8x8xbf16, #tpu.memory_space<vmem>>, vector<1x1x8x8xbf16>
    %6 = vector.shape_cast %5 : vector<1x1x8x8xbf16> to vector<8x8xbf16>
    %cst = arith.constant dense<0.000000e+00> : vector<8x8xf32>
    %7 = tpu.matmul %4, %6, %cst {dimension_numbers = #tpu.dot_dimension_numbers<[1], [1], [0], [0], [0, 0, 1, 0], [], []>} : vector<8x8xbf16>, vector<8x8xbf16>, vector<8x8xf32> -> vector<8x8xf32>
    %cst_8 = arith.constant 0.353553385 : f32
    %8 = vector.broadcast %cst_8 : f32 to vector<8x8xf32>
    %9 = arith.mulf %7, %8 : vector<8x8xf32>
    %c0_9 = arith.constant 0 : index
    %c0_10 = arith.constant 0 : index
    %c0_11 = arith.constant 0 : index
    %10 = vector.load %arg3[%c0_9, %c0_10, %c0_11] : memref<1x1x8xf32, #tpu.memory_space<vmem>>, vector<1x1x8xf32>
    %11 = vector.shape_cast %10 : vector<1x1x8xf32> to vector<1x8xf32>
    %cst_12 = arith.constant 0.000000e+00 : f32
    %12 = vector.broadcast %cst_12 : f32 to vector<1x8xf32>
    %13 = arith.cmpf ogt, %11, %12 : vector<1x8xf32>
    %cst_13 = arith.constant -1.000000e+09 : f32
    %14 = vector.shape_cast %13 : vector<1x8xi1> to vector<1x8xi1>
    %15 = vector.broadcast %14 : vector<1x8xi1> to vector<8x8xi1>
    %16 = vector.broadcast %cst_13 : f32 to vector<8x8xf32>
    %17 = arith.select %15, %9, %16 : vector<8x8xi1>, vector<8x8xf32>
    %c0_14 = arith.constant 0 : index
    %c0_15 = arith.constant 0 : index
    %18 = vector.load %arg8[%c0_14, %c0_15] : memref<8x1xf32, #tpu.memory_space<vmem>>, vector<8x1xf32>
    %cst_16 = arith.constant dense<0xFF800000> : vector<8xf32>
    %19 = vector.multi_reduction <maximumf>, %17, %cst_16 [1] : vector<8x8xf32> to vector<8xf32>
    %20 = vector.shape_cast %19 : vector<8xf32> to vector<8x1xf32>
    %21 = arith.maximumf %18, %20 : vector<8x1xf32>
    %22 = arith.subf %18, %21 : vector<8x1xf32>
    %23 = math.exp %22 : vector<8x1xf32>
    %24 = vector.broadcast %21 : vector<8x1xf32> to vector<8x8xf32>
    %25 = arith.subf %17, %24 : vector<8x8xf32>
    %26 = math.exp %25 : vector<8x8xf32>
    %c0_17 = arith.constant 0 : index
    %c0_18 = arith.constant 0 : index
    %27 = vector.load %arg9[%c0_17, %c0_18] : memref<8x1xf32, #tpu.memory_space<vmem>>, vector<8x1xf32>
    %28 = arith.mulf %23, %27 : vector<8x1xf32>
    %cst_19 = arith.constant dense<0.000000e+00> : vector<8xf32>
    %29 = vector.multi_reduction <add>, %26, %cst_19 [1] : vector<8x8xf32> to vector<8xf32>
    %30 = vector.shape_cast %29 : vector<8xf32> to vector<8x1xf32>
    %31 = arith.addf %28, %30 : vector<8x1xf32>
    %c0_20 = arith.constant 0 : index
    %c0_21 = arith.constant 0 : index
    %32 = vector.load %arg9[%c0_20, %c0_21] : memref<8x1xf32, #tpu.memory_space<vmem>>, vector<8x1xf32>
    tpu.vector_store %arg9[%c0_20, %c0_21], %31 {strides = array<i32>} : memref<8x1xf32, #tpu.memory_space<vmem>>, vector<8x1xf32>,
    %c0_22 = arith.constant 0 : index
    %c0_23 = arith.constant 0 : index
    %33 = vector.load %arg10[%c0_22, %c0_23] : memref<8x8xf32, #tpu.memory_space<vmem>>, vector<8x8xf32>
    %34 = vector.broadcast %23 : vector<8x1xf32> to vector<8x8xf32>
    %35 = arith.mulf %34, %33 : vector<8x8xf32>
    %36 = arith.truncf %26 : vector<8x8xf32> to vector<8x8xbf16>
    %c0_24 = arith.constant 0 : index
    %c0_25 = arith.constant 0 : index
    %c0_26 = arith.constant 0 : index
    %c0_27 = arith.constant 0 : index
    %37 = vector.load %arg6[%c0_24, %c0_25, %c0_26, %c0_27] : memref<1x1x8x8xbf16, #tpu.memory_space<vmem>>, vector<1x1x8x8xbf16>
    %38 = vector.shape_cast %37 : vector<1x1x8x8xbf16> to vector<8x8xbf16>
    %cst_28 = arith.constant dense<0.000000e+00> : vector<8x8xf32>
    %39 = tpu.matmul %36, %38, %cst_28 {dimension_numbers = #tpu.dot_dimension_numbers<[1], [0], [0], [1], [0, 0, 1, 1], [], []>} : vector<8x8xbf16>, vector<8x8xbf16>, vector<8x8xf32> -> vector<8x8xf32>
    %40 = arith.addf %35, %39 : vector<8x8xf32>
    %c0_29 = arith.constant 0 : index
    %c0_30 = arith.constant 0 : index
    %41 = vector.load %arg10[%c0_29, %c0_30] : memref<8x8xf32, #tpu.memory_space<vmem>>, vector<8x8xf32>
    tpu.vector_store %arg10[%c0_29, %c0_30], %40 {strides = array<i32>} : memref<8x8xf32, #tpu.memory_space<vmem>>, vector<8x8xf32>,
    %c0_31 = arith.constant 0 : index
    %c0_32 = arith.constant 0 : index
    %42 = vector.load %arg8[%c0_31, %c0_32] : memref<8x1xf32, #tpu.memory_space<vmem>>, vector<8x1xf32>
    tpu.vector_store %arg8[%c0_31, %c0_32], %21 {strides = array<i32>} : memref<8x1xf32, #tpu.memory_space<vmem>>, vector<8x1xf32>,
    %c0_i32_33 = arith.constant 0 : i32
    %43 = arith.cmpi eq, %arg2, %c0_i32_33 : i32
    %44 = arith.extui %43 : i1 to i32
    %c0_i32_34 = arith.constant 0 : i32
    %45 = arith.cmpi ne, %44, %c0_i32_34 : i32
    scf.if %45 {
      %c0_35 = arith.constant 0 : index
      %c0_36 = arith.constant 0 : index
      %46 = vector.load %arg10[%c0_35, %c0_36] : memref<8x8xf32, #tpu.memory_space<vmem>>, vector<8x8xf32>
      %c0_37 = arith.constant 0 : index
      %c0_38 = arith.constant 0 : index
      %47 = vector.load %arg9[%c0_37, %c0_38] : memref<8x1xf32, #tpu.memory_space<vmem>>, vector<8x1xf32>
      %48 = tpu.reciprocal %47 {approx = true} : vector<8x1xf32> -> vector<8x1xf32>
      %49 = vector.broadcast %48 : vector<8x1xf32> to vector<8x8xf32>
      %50 = arith.mulf %46, %49 : vector<8x8xf32>
      %51 = arith.truncf %50 : vector<8x8xf32> to vector<8x8xbf16>
      %c0_39 = arith.constant 0 : index
      %c0_40 = arith.constant 0 : index
      %c0_41 = arith.constant 0 : index
      %c0_42 = arith.constant 0 : index
      %52 = vector.load %arg7[%c0_39, %c0_40, %c0_41, %c0_42] : memref<1x1x8x8xbf16, #tpu.memory_space<vmem>>, vector<1x1x8x8xbf16>
      %53 = vector.shape_cast %52 : vector<1x1x8x8xbf16> to vector<8x8xbf16>
      %54 = vector.shape_cast %51 : vector<8x8xbf16> to vector<1x1x8x8xbf16>
      tpu.vector_store %arg7[%c0_39, %c0_40, %c0_41, %c0_42], %54 {strides = array<i32>} : memref<1x1x8x8xbf16, #tpu.memory_space<vmem>>, vector<1x1x8x8xbf16>,
    } else {
    }
    return
  }
  func.func @transform_0(%arg0: i32, %arg1: i32, %arg2: i32) -> (i32, i32, i32) {
    %c0_i32 = arith.constant 0 : i32
    %c0_i32_0 = arith.constant 0 : i32
    return %arg0, %c0_i32, %arg2 : i32, i32, i32
  }
  func.func @transform_1(%arg0: i32, %arg1: i32, %arg2: i32) -> (i32, i32, i32, i32) {
    %c0_i32 = arith.constant 0 : i32
    %c0_i32_0 = arith.constant 0 : i32
    %c0_i32_1 = arith.constant 0 : i32
    return %arg0, %arg1, %c0_i32, %c0_i32_0 : i32, i32, i32, i32
  }
  func.func @transform_2(%arg0: i32, %arg1: i32, %arg2: i32) -> (i32, i32, i32, i32) {
    %c0_i32 = arith.constant 0 : i32
    %c0_i32_0 = arith.constant 0 : i32
    return %arg0, %arg1, %arg2, %c0_i32 : i32, i32, i32, i32
  }
  func.func @transform_3(%arg0: i32, %arg1: i32, %arg2: i32) -> (i32, i32, i32, i32) {
    %c0_i32 = arith.constant 0 : i32
    %c0_i32_0 = arith.constant 0 : i32
    return %arg0, %arg1, %arg2, %c0_i32 : i32, i32, i32, i32
  }
  func.func @transform_4(%arg0: i32, %arg1: i32, %arg2: i32) -> (i32, i32, i32, i32) {
    %c0_i32 = arith.constant 0 : i32
    %c0_i32_0 = arith.constant 0 : i32
    %c0_i32_1 = arith.constant 0 : i32
    return %arg0, %arg1, %c0_i32, %c0_i32_0 : i32, i32, i32, i32
  }
}

module attributes {stable_mosaic.version = 11 : i64} {
  func.func @_fused_linear_kernel(%arg0: i32, %arg1: i32, %arg2: memref<16x64xbf16, #tpu.memory_space<vmem>>, %arg3: memref<64x32xbf16, #tpu.memory_space<vmem>>, %arg4: memref<1x32xf32, #tpu.memory_space<vmem>>, %arg5: memref<16x32xf32, #tpu.memory_space<vmem>>, %arg6: memref<16x32xf32, #tpu.memory_space<vmem>>) attributes {dimension_semantics = [#tpu.dimension_semantics<parallel>, #tpu.dimension_semantics<parallel>], iteration_bounds = array<i64: 1, 1>, scalar_prefetch = 0 : i64, scratch_operands = 0 : i64, tpu.core_type = #tpu.core_type<tc>, window_params = [{transform_indices = @transform_0, window_bounds = array<i64: 16, 64>}, {transform_indices = @transform_1, window_bounds = array<i64: 64, 32>}, {transform_indices = @transform_2, window_bounds = array<i64: 1, 32>}, {transform_indices = @transform_3, window_bounds = array<i64: 16, 32>}, {transform_indices = @transform_4, window_bounds = array<i64: 16, 32>}]} {
    %c0 = arith.constant 0 : index
    %c0_0 = arith.constant 0 : index
    %0 = vector.load %arg2[%c0, %c0_0] : memref<16x64xbf16, #tpu.memory_space<vmem>>, vector<16x64xbf16>
    %c0_1 = arith.constant 0 : index
    %c0_2 = arith.constant 0 : index
    %1 = vector.load %arg3[%c0_1, %c0_2] : memref<64x32xbf16, #tpu.memory_space<vmem>>, vector<64x32xbf16>
    %cst = arith.constant dense<0.000000e+00> : vector<16x32xf32>
    %2 = tpu.matmul %0, %1, %cst {dimension_numbers = #tpu.dot_dimension_numbers<[1], [0], [0], [1], [0, 0, 1, 1], [], []>} : vector<16x64xbf16>, vector<64x32xbf16>, vector<16x32xf32> -> vector<16x32xf32>
    %c0_3 = arith.constant 0 : index
    %c0_4 = arith.constant 0 : index
    %3 = vector.load %arg4[%c0_3, %c0_4] : memref<1x32xf32, #tpu.memory_space<vmem>>, vector<1x32xf32>
    %4 = vector.broadcast %3 : vector<1x32xf32> to vector<16x32xf32>
    %5 = arith.addf %2, %4 : vector<16x32xf32>
    %c0_5 = arith.constant 0 : index
    %c0_6 = arith.constant 0 : index
    %6 = vector.load %arg5[%c0_5, %c0_6] : memref<16x32xf32, #tpu.memory_space<vmem>>, vector<16x32xf32>
    %7 = arith.addf %5, %6 : vector<16x32xf32>
    %c0_7 = arith.constant 0 : index
    %c0_8 = arith.constant 0 : index
    %8 = vector.load %arg6[%c0_7, %c0_8] : memref<16x32xf32, #tpu.memory_space<vmem>>, vector<16x32xf32>
    tpu.vector_store %arg6[%c0_7, %c0_8], %7 {strides = array<i32>} : memref<16x32xf32, #tpu.memory_space<vmem>>, vector<16x32xf32>,
    return
  }
  func.func @transform_0(%arg0: i32, %arg1: i32) -> (i32, i32) {
    %c0_i32 = arith.constant 0 : i32
    %c0_i32_0 = arith.constant 0 : i32
    return %arg0, %c0_i32 : i32, i32
  }
  func.func @transform_1(%arg0: i32, %arg1: i32) -> (i32, i32) {
    %c0_i32 = arith.constant 0 : i32
    %c0_i32_0 = arith.constant 0 : i32
    return %c0_i32, %arg1 : i32, i32
  }
  func.func @transform_2(%arg0: i32, %arg1: i32) -> (i32, i32) {
    %c0_i32 = arith.constant 0 : i32
    %c0_i32_0 = arith.constant 0 : i32
    return %c0_i32, %arg1 : i32, i32
  }
  func.func @transform_3(%arg0: i32, %arg1: i32) -> (i32, i32) {
    %c0_i32 = arith.constant 0 : i32
    return %arg0, %arg1 : i32, i32
  }
  func.func @transform_4(%arg0: i32, %arg1: i32) -> (i32, i32) {
    %c0_i32 = arith.constant 0 : i32
    return %arg0, %arg1 : i32, i32
  }
}

module attributes {stable_mosaic.version = 11 : i64} {
  func.func @_fused_linear_kernel(%arg0: i32, %arg1: i32, %arg2: memref<16x32xf32, #tpu.memory_space<vmem>>, %arg3: memref<1x32xf32, #tpu.memory_space<vmem>>, %arg4: memref<1x32xf32, #tpu.memory_space<vmem>>, %arg5: memref<32x64xbf16, #tpu.memory_space<vmem>>, %arg6: memref<1x64xf32, #tpu.memory_space<vmem>>, %arg7: memref<16x64xbf16, #tpu.memory_space<vmem>>) attributes {dimension_semantics = [#tpu.dimension_semantics<parallel>, #tpu.dimension_semantics<parallel>], iteration_bounds = array<i64: 1, 1>, scalar_prefetch = 0 : i64, scratch_operands = 0 : i64, tpu.core_type = #tpu.core_type<tc>, window_params = [{transform_indices = @transform_0, window_bounds = array<i64: 16, 32>}, {pipeline_mode = #tpu.pipeline_mode<synchronous>, transform_indices = @transform_1, window_bounds = array<i64: 1, 32>}, {pipeline_mode = #tpu.pipeline_mode<synchronous>, transform_indices = @transform_2, window_bounds = array<i64: 1, 32>}, {transform_indices = @transform_3, window_bounds = array<i64: 32, 64>}, {transform_indices = @transform_4, window_bounds = array<i64: 1, 64>}, {transform_indices = @transform_5, window_bounds = array<i64: 16, 64>}]} {
    %c0 = arith.constant 0 : index
    %c0_0 = arith.constant 0 : index
    %0 = vector.load %arg2[%c0, %c0_0] : memref<16x32xf32, #tpu.memory_space<vmem>>, vector<16x32xf32>
    %cst = arith.constant dense<0.000000e+00> : vector<16xf32>
    %1 = vector.multi_reduction <add>, %0, %cst [1] : vector<16x32xf32> to vector<16xf32>
    %2 = vector.shape_cast %1 : vector<16xf32> to vector<16x1xf32>
    %cst_1 = arith.constant 3.200000e+01 : f32
    %3 = vector.broadcast %cst_1 : f32 to vector<16x1xf32>
    %4 = arith.divf %2, %3 : vector<16x1xf32>
    %5 = vector.broadcast %4 : vector<16x1xf32> to vector<16x32xf32>
    %6 = arith.subf %0, %5 : vector<16x32xf32>
    %7 = arith.mulf %6, %6 : vector<16x32xf32>
    %cst_2 = arith.constant dense<0.000000e+00> : vector<16xf32>
    %8 = vector.multi_reduction <add>, %7, %cst_2 [1] : vector<16x32xf32> to vector<16xf32>
    %9 = vector.shape_cast %8 : vector<16xf32> to vector<16x1xf32>
    %cst_3 = arith.constant 3.200000e+01 : f32
    %10 = vector.broadcast %cst_3 : f32 to vector<16x1xf32>
    %11 = arith.divf %9, %10 : vector<16x1xf32>
    %cst_4 = arith.constant 9.99999997E-7 : f32
    %12 = vector.broadcast %cst_4 : f32 to vector<16x1xf32>
    %13 = arith.addf %11, %12 : vector<16x1xf32>
    %14 = math.rsqrt %13 : vector<16x1xf32>
    %15 = vector.broadcast %14 : vector<16x1xf32> to vector<16x32xf32>
    %16 = arith.mulf %6, %15 : vector<16x32xf32>
    %c0_5 = arith.constant 0 : index
    %c0_6 = arith.constant 0 : index
    %17 = vector.load %arg3[%c0_5, %c0_6] : memref<1x32xf32, #tpu.memory_space<vmem>>, vector<1x32xf32>
    %18 = vector.broadcast %17 : vector<1x32xf32> to vector<16x32xf32>
    %19 = arith.mulf %16, %18 : vector<16x32xf32>
    %c0_7 = arith.constant 0 : index
    %c0_8 = arith.constant 0 : index
    %20 = vector.load %arg4[%c0_7, %c0_8] : memref<1x32xf32, #tpu.memory_space<vmem>>, vector<1x32xf32>
    %21 = vector.broadcast %20 : vector<1x32xf32> to vector<16x32xf32>
    %22 = arith.addf %19, %21 : vector<16x32xf32>
    %23 = arith.truncf %22 : vector<16x32xf32> to vector<16x32xbf16>
    %c0_9 = arith.constant 0 : index
    %c0_10 = arith.constant 0 : index
    %24 = vector.load %arg5[%c0_9, %c0_10] : memref<32x64xbf16, #tpu.memory_space<vmem>>, vector<32x64xbf16>
    %cst_11 = arith.constant dense<0.000000e+00> : vector<16x64xf32>
    %25 = tpu.matmul %23, %24, %cst_11 {dimension_numbers = #tpu.dot_dimension_numbers<[1], [0], [0], [1], [0, 0, 1, 1], [], []>} : vector<16x32xbf16>, vector<32x64xbf16>, vector<16x64xf32> -> vector<16x64xf32>
    %c0_12 = arith.constant 0 : index
    %c0_13 = arith.constant 0 : index
    %26 = vector.load %arg6[%c0_12, %c0_13] : memref<1x64xf32, #tpu.memory_space<vmem>>, vector<1x64xf32>
    %27 = vector.broadcast %26 : vector<1x64xf32> to vector<16x64xf32>
    %28 = arith.addf %25, %27 : vector<16x64xf32>
    %cst_14 = arith.constant 0.000000e+00 : f32
    %29 = vector.broadcast %cst_14 : f32 to vector<16x64xf32>
    %30 = arith.maximumf %28, %29 : vector<16x64xf32>
    %31 = arith.truncf %30 : vector<16x64xf32> to vector<16x64xbf16>
    %c0_15 = arith.constant 0 : index
    %c0_16 = arith.constant 0 : index
    %32 = vector.load %arg7[%c0_15, %c0_16] : memref<16x64xbf16, #tpu.memory_space<vmem>>, vector<16x64xbf16>
    tpu.vector_store %arg7[%c0_15, %c0_16], %31 {strides = array<i32>} : memref<16x64xbf16, #tpu.memory_space<vmem>>, vector<16x64xbf16>,
    return
  }
  func.func @transform_0(%arg0: i32, %arg1: i32) -> (i32, i32) {
    %c0_i32 = arith.constant 0 : i32
    %c0_i32_0 = arith.constant 0 : i32
    return %arg0, %c0_i32 : i32, i32
  }
  func.func @transform_1(%arg0: i32, %arg1: i32) -> (i32, i32) {
    %c0_i32 = arith.constant 0 : i32
    %c0_i32_0 = arith.constant 0 : i32
    %c0_i32_1 = arith.constant 0 : i32
    return %c0_i32, %c0_i32_0 : i32, i32
  }
  func.func @transform_2(%arg0: i32, %arg1: i32) -> (i32, i32) {
    %c0_i32 = arith.constant 0 : i32
    %c0_i32_0 = arith.constant 0 : i32
    %c0_i32_1 = arith.constant 0 : i32
    return %c0_i32, %c0_i32_0 : i32, i32
  }
  func.func @transform_3(%arg0: i32, %arg1: i32) -> (i32, i32) {
    %c0_i32 = arith.constant 0 : i32
    %c0_i32_0 = arith.constant 0 : i32
    return %c0_i32, %arg1 : i32, i32
  }
  func.func @transform_4(%arg0: i32, %arg1: i32) -> (i32, i32) {
    %c0_i32 = arith.constant 0 : i32
    %c0_i32_0 = arith.constant 0 : i32
    return %c0_i32, %arg1 : i32, i32
  }
  func.func @transform_5(%arg0: i32, %arg1: i32) -> (i32, i32) {
    %c0_i32 = arith.constant 0 : i32
    return %arg0, %arg1 : i32, i32
  }
}

module attributes {stable_mosaic.version = 11 : i64} {
  func.func @_layernorm_kernel(%arg0: i32, %arg1: memref<16x32xf32, #tpu.memory_space<vmem>>, %arg2: memref<1x32xf32, #tpu.memory_space<vmem>>, %arg3: memref<1x32xf32, #tpu.memory_space<vmem>>, %arg4: memref<16x32xf32, #tpu.memory_space<vmem>>) attributes {dimension_semantics = [#tpu.dimension_semantics<parallel>], iteration_bounds = array<i64: 1>, scalar_prefetch = 0 : i64, scratch_operands = 0 : i64, tpu.core_type = #tpu.core_type<tc>, window_params = [{transform_indices = @transform_0, window_bounds = array<i64: 16, 32>}, {pipeline_mode = #tpu.pipeline_mode<synchronous>, transform_indices = @transform_1, window_bounds = array<i64: 1, 32>}, {pipeline_mode = #tpu.pipeline_mode<synchronous>, transform_indices = @transform_2, window_bounds = array<i64: 1, 32>}, {transform_indices = @transform_3, window_bounds = array<i64: 16, 32>}]} {
    %c0 = arith.constant 0 : index
    %c0_0 = arith.constant 0 : index
    %0 = vector.load %arg1[%c0, %c0_0] : memref<16x32xf32, #tpu.memory_space<vmem>>, vector<16x32xf32>
    %cst = arith.constant dense<0.000000e+00> : vector<16xf32>
    %1 = vector.multi_reduction <add>, %0, %cst [1] : vector<16x32xf32> to vector<16xf32>
    %2 = vector.shape_cast %1 : vector<16xf32> to vector<16x1xf32>
    %cst_1 = arith.constant 3.200000e+01 : f32
    %3 = vector.broadcast %cst_1 : f32 to vector<16x1xf32>
    %4 = arith.divf %2, %3 : vector<16x1xf32>
    %5 = vector.broadcast %4 : vector<16x1xf32> to vector<16x32xf32>
    %6 = arith.subf %0, %5 : vector<16x32xf32>
    %7 = arith.mulf %6, %6 : vector<16x32xf32>
    %cst_2 = arith.constant dense<0.000000e+00> : vector<16xf32>
    %8 = vector.multi_reduction <add>, %7, %cst_2 [1] : vector<16x32xf32> to vector<16xf32>
    %9 = vector.shape_cast %8 : vector<16xf32> to vector<16x1xf32>
    %cst_3 = arith.constant 3.200000e+01 : f32
    %10 = vector.broadcast %cst_3 : f32 to vector<16x1xf32>
    %11 = arith.divf %9, %10 : vector<16x1xf32>
    %cst_4 = arith.constant 9.99999997E-7 : f32
    %12 = vector.broadcast %cst_4 : f32 to vector<16x1xf32>
    %13 = arith.addf %11, %12 : vector<16x1xf32>
    %14 = math.rsqrt %13 : vector<16x1xf32>
    %15 = vector.broadcast %14 : vector<16x1xf32> to vector<16x32xf32>
    %16 = arith.mulf %6, %15 : vector<16x32xf32>
    %c0_5 = arith.constant 0 : index
    %c0_6 = arith.constant 0 : index
    %17 = vector.load %arg2[%c0_5, %c0_6] : memref<1x32xf32, #tpu.memory_space<vmem>>, vector<1x32xf32>
    %18 = vector.broadcast %17 : vector<1x32xf32> to vector<16x32xf32>
    %19 = arith.mulf %16, %18 : vector<16x32xf32>
    %c0_7 = arith.constant 0 : index
    %c0_8 = arith.constant 0 : index
    %20 = vector.load %arg3[%c0_7, %c0_8] : memref<1x32xf32, #tpu.memory_space<vmem>>, vector<1x32xf32>
    %21 = vector.broadcast %20 : vector<1x32xf32> to vector<16x32xf32>
    %22 = arith.addf %19, %21 : vector<16x32xf32>
    %c0_9 = arith.constant 0 : index
    %c0_10 = arith.constant 0 : index
    %23 = vector.load %arg4[%c0_9, %c0_10] : memref<16x32xf32, #tpu.memory_space<vmem>>, vector<16x32xf32>
    tpu.vector_store %arg4[%c0_9, %c0_10], %22 {strides = array<i32>} : memref<16x32xf32, #tpu.memory_space<vmem>>, vector<16x32xf32>,
    return
  }
  func.func @transform_0(%arg0: i32) -> (i32, i32) {
    %c0_i32 = arith.constant 0 : i32
    %c0_i32_0 = arith.constant 0 : i32
    return %arg0, %c0_i32 : i32, i32
  }
  func.func @transform_1(%arg0: i32) -> (i32, i32) {
    %c0_i32 = arith.constant 0 : i32
    %c0_i32_0 = arith.constant 0 : i32
    %c0_i32_1 = arith.constant 0 : i32
    return %c0_i32, %c0_i32_0 : i32, i32
  }
  func.func @transform_2(%arg0: i32) -> (i32, i32) {
    %c0_i32 = arith.constant 0 : i32
    %c0_i32_0 = arith.constant 0 : i32
    %c0_i32_1 = arith.constant 0 : i32
    return %c0_i32, %c0_i32_0 : i32, i32
  }
  func.func @transform_3(%arg0: i32) -> (i32, i32) {
    %c0_i32 = arith.constant 0 : i32
    %c0_i32_0 = arith.constant 0 : i32
    return %arg0, %c0_i32 : i32, i32
  }
}

module attributes {stable_mosaic.version = 11 : i64} {
  func.func @_fused_linear_kernel(%arg0: i32, %arg1: i32, %arg2: memref<16x32xf32, #tpu.memory_space<vmem>>, %arg3: memref<32x64xbf16, #tpu.memory_space<vmem>>, %arg4: memref<1x64xf32, #tpu.memory_space<vmem>>, %arg5: memref<16x64xbf16, #tpu.memory_space<vmem>>) attributes {dimension_semantics = [#tpu.dimension_semantics<parallel>, #tpu.dimension_semantics<parallel>], iteration_bounds = array<i64: 1, 1>, scalar_prefetch = 0 : i64, scratch_operands = 0 : i64, tpu.core_type = #tpu.core_type<tc>, window_params = [{transform_indices = @transform_0, window_bounds = array<i64: 16, 32>}, {transform_indices = @transform_1, window_bounds = array<i64: 32, 64>}, {transform_indices = @transform_2, window_bounds = array<i64: 1, 64>}, {transform_indices = @transform_3, window_bounds = array<i64: 16, 64>}]} {
    %c0 = arith.constant 0 : index
    %c0_0 = arith.constant 0 : index
    %0 = vector.load %arg2[%c0, %c0_0] : memref<16x32xf32, #tpu.memory_space<vmem>>, vector<16x32xf32>
    %1 = arith.truncf %0 : vector<16x32xf32> to vector<16x32xbf16>
    %c0_1 = arith.constant 0 : index
    %c0_2 = arith.constant 0 : index
    %2 = vector.load %arg3[%c0_1, %c0_2] : memref<32x64xbf16, #tpu.memory_space<vmem>>, vector<32x64xbf16>
    %cst = arith.constant dense<0.000000e+00> : vector<16x64xf32>
    %3 = tpu.matmul %1, %2, %cst {dimension_numbers = #tpu.dot_dimension_numbers<[1], [0], [0], [1], [0, 0, 1, 1], [], []>} : vector<16x32xbf16>, vector<32x64xbf16>, vector<16x64xf32> -> vector<16x64xf32>
    %c0_3 = arith.constant 0 : index
    %c0_4 = arith.constant 0 : index
    %4 = vector.load %arg4[%c0_3, %c0_4] : memref<1x64xf32, #tpu.memory_space<vmem>>, vector<1x64xf32>
    %5 = vector.broadcast %4 : vector<1x64xf32> to vector<16x64xf32>
    %6 = arith.addf %3, %5 : vector<16x64xf32>
    %7 = arith.truncf %6 : vector<16x64xf32> to vector<16x64xbf16>
    %c0_5 = arith.constant 0 : index
    %c0_6 = arith.constant 0 : index
    %8 = vector.load %arg5[%c0_5, %c0_6] : memref<16x64xbf16, #tpu.memory_space<vmem>>, vector<16x64xbf16>
    tpu.vector_store %arg5[%c0_5, %c0_6], %7 {strides = array<i32>} : memref<16x64xbf16, #tpu.memory_space<vmem>>, vector<16x64xbf16>,
    return
  }
  func.func @transform_0(%arg0: i32, %arg1: i32) -> (i32, i32) {
    %c0_i32 = arith.constant 0 : i32
    %c0_i32_0 = arith.constant 0 : i32
    return %arg0, %c0_i32 : i32, i32
  }
  func.func @transform_1(%arg0: i32, %arg1: i32) -> (i32, i32) {
    %c0_i32 = arith.constant 0 : i32
    %c0_i32_0 = arith.constant 0 : i32
    return %c0_i32, %arg1 : i32, i32
  }
  func.func @transform_2(%arg0: i32, %arg1: i32) -> (i32, i32) {
    %c0_i32 = arith.constant 0 : i32
    %c0_i32_0 = arith.constant 0 : i32
    return %c0_i32, %arg1 : i32, i32
  }
  func.func @transform_3(%arg0: i32, %arg1: i32) -> (i32, i32) {
    %c0_i32 = arith.constant 0 : i32
    return %arg0, %arg1 : i32, i32
  }
}

module attributes {stable_mosaic.version = 11 : i64} {
  func.func @_sub_lse_kernel(%arg0: i32, %arg1: i32, %arg2: memref<16x32xf32, #tpu.memory_space<vmem>>, %arg3: memref<16x1xf32, #tpu.memory_space<vmem>>, %arg4: memref<16x32xf32, #tpu.memory_space<vmem>>) attributes {dimension_semantics = [#tpu.dimension_semantics<parallel>, #tpu.dimension_semantics<parallel>], iteration_bounds = array<i64: 1, 1>, scalar_prefetch = 0 : i64, scratch_operands = 0 : i64, tpu.core_type = #tpu.core_type<tc>, window_params = [{transform_indices = @transform_0, window_bounds = array<i64: 16, 32>}, {transform_indices = @transform_1, window_bounds = array<i64: 16, 1>}, {transform_indices = @transform_2, window_bounds = array<i64: 16, 32>}]} {
    %c0 = arith.constant 0 : index
    %c0_0 = arith.constant 0 : index
    %0 = vector.load %arg2[%c0, %c0_0] : memref<16x32xf32, #tpu.memory_space<vmem>>, vector<16x32xf32>
    %c0_1 = arith.constant 0 : index
    %c0_2 = arith.constant 0 : index
    %1 = vector.load %arg3[%c0_1, %c0_2] : memref<16x1xf32, #tpu.memory_space<vmem>>, vector<16x1xf32>
    %2 = vector.broadcast %1 : vector<16x1xf32> to vector<16x32xf32>
    %3 = arith.subf %0, %2 : vector<16x32xf32>
    %c0_3 = arith.constant 0 : index
    %c0_4 = arith.constant 0 : index
    %4 = vector.load %arg4[%c0_3, %c0_4] : memref<16x32xf32, #tpu.memory_space<vmem>>, vector<16x32xf32>
    tpu.vector_store %arg4[%c0_3, %c0_4], %3 {strides = array<i32>} : memref<16x32xf32, #tpu.memory_space<vmem>>, vector<16x32xf32>,
    return
  }
  func.func @transform_0(%arg0: i32, %arg1: i32) -> (i32, i32) {
    %c0_i32 = arith.constant 0 : i32
    return %arg0, %arg1 : i32, i32
  }
  func.func @transform_1(%arg0: i32, %arg1: i32) -> (i32, i32) {
    %c0_i32 = arith.constant 0 : i32
    %c0_i32_0 = arith.constant 0 : i32
    return %arg0, %c0_i32 : i32, i32
  }
  func.func @transform_2(%arg0: i32, %arg1: i32) -> (i32, i32) {
    %c0_i32 = arith.constant 0 : i32
    return %arg0, %arg1 : i32, i32
  }
}

module attributes {stable_mosaic.version = 11 : i64} {
  func.func @_proj_lse_kernel(%arg0: i32, %arg1: i32, %arg2: memref<16x32xf32, #tpu.memory_space<vmem>>, %arg3: memref<1x32xf32, #tpu.memory_space<vmem>>, %arg4: memref<1x32xf32, #tpu.memory_space<vmem>>, %arg5: memref<32x32xbf16, #tpu.memory_space<vmem>>, %arg6: memref<1x32xf32, #tpu.memory_space<vmem>>, %arg7: memref<16x32xf32, #tpu.memory_space<vmem>>, %arg8: memref<16x1xf32, #tpu.memory_space<vmem>>, %arg9: memref<16x1xf32, #tpu.memory_space<vmem>>, %arg10: memref<16x1xf32, #tpu.memory_space<vmem>>) attributes {dimension_semantics = [#tpu.dimension_semantics<parallel>, #tpu.dimension_semantics<arbitrary>], iteration_bounds = array<i64: 1, 1>, scalar_prefetch = 0 : i64, scratch_operands = 2 : i64, tpu.core_type = #tpu.core_type<tc>, window_params = [{transform_indices = @transform_0, window_bounds = array<i64: 16, 32>}, {pipeline_mode = #tpu.pipeline_mode<synchronous>, transform_indices = @transform_1, window_bounds = array<i64: 1, 32>}, {pipeline_mode = #tpu.pipeline_mode<synchronous>, transform_indices = @transform_2, window_bounds = array<i64: 1, 32>}, {transform_indices = @transform_3, window_bounds = array<i64: 32, 32>}, {transform_indices = @transform_4, window_bounds = array<i64: 1, 32>}, {transform_indices = @transform_5, window_bounds = array<i64: 16, 32>}, {transform_indices = @transform_6, window_bounds = array<i64: 16, 1>}]} {
    %c0_i32 = arith.constant 0 : i32
    %0 = arith.cmpi eq, %arg1, %c0_i32 : i32
    %1 = arith.extui %0 : i1 to i32
    %c0_i32_0 = arith.constant 0 : i32
    %2 = arith.cmpi ne, %1, %c0_i32_0 : i32
    scf.if %2 {
      %cst_29 = arith.constant 0xFF800000 : f32
      %52 = vector.broadcast %cst_29 : f32 to vector<16x1xf32>
      %c0_30 = arith.constant 0 : index
      %c0_31 = arith.constant 0 : index
      %53 = vector.load %arg9[%c0_30, %c0_31] : memref<16x1xf32, #tpu.memory_space<vmem>>, vector<16x1xf32>
      tpu.vector_store %arg9[%c0_30, %c0_31], %52 {strides = array<i32>} : memref<16x1xf32, #tpu.memory_space<vmem>>, vector<16x1xf32>,
      %cst_32 = arith.constant 0.000000e+00 : f32
      %54 = vector.broadcast %cst_32 : f32 to vector<16x1xf32>
      %c0_33 = arith.constant 0 : index
      %c0_34 = arith.constant 0 : index
      %55 = vector.load %arg10[%c0_33, %c0_34] : memref<16x1xf32, #tpu.memory_space<vmem>>, vector<16x1xf32>
      tpu.vector_store %arg10[%c0_33, %c0_34], %54 {strides = array<i32>} : memref<16x1xf32, #tpu.memory_space<vmem>>, vector<16x1xf32>,
    } else {
    }
    %c0 = arith.constant 0 : index
    %c0_1 = arith.constant 0 : index
    %3 = vector.load %arg2[%c0, %c0_1] : memref<16x32xf32, #tpu.memory_space<vmem>>, vector<16x32xf32>
    %cst = arith.constant dense<0.000000e+00> : vector<16xf32>
    %4 = vector.multi_reduction <add>, %3, %cst [1] : vector<16x32xf32> to vector<16xf32>
    %5 = vector.shape_cast %4 : vector<16xf32> to vector<16x1xf32>
    %cst_2 = arith.constant 3.200000e+01 : f32
    %6 = vector.broadcast %cst_2 : f32 to vector<16x1xf32>
    %7 = arith.divf %5, %6 : vector<16x1xf32>
    %8 = vector.broadcast %7 : vector<16x1xf32> to vector<16x32xf32>
    %9 = arith.subf %3, %8 : vector<16x32xf32>
    %10 = arith.mulf %9, %9 : vector<16x32xf32>
    %cst_3 = arith.constant dense<0.000000e+00> : vector<16xf32>
    %11 = vector.multi_reduction <add>, %10, %cst_3 [1] : vector<16x32xf32> to vector<16xf32>
    %12 = vector.shape_cast %11 : vector<16xf32> to vector<16x1xf32>
    %cst_4 = arith.constant 3.200000e+01 : f32
    %13 = vector.broadcast %cst_4 : f32 to vector<16x1xf32>
    %14 = arith.divf %12, %13 : vector<16x1xf32>
    %cst_5 = arith.constant 9.99999997E-7 : f32
    %15 = vector.broadcast %cst_5 : f32 to vector<16x1xf32>
    %16 = arith.addf %14, %15 : vector<16x1xf32>
    %17 = math.rsqrt %16 : vector<16x1xf32>
    %18 = vector.broadcast %17 : vector<16x1xf32> to vector<16x32xf32>
    %19 = arith.mulf %9, %18 : vector<16x32xf32>
    %c0_6 = arith.constant 0 : index
    %c0_7 = arith.constant 0 : index
    %20 = vector.load %arg3[%c0_6, %c0_7] : memref<1x32xf32, #tpu.memory_space<vmem>>, vector<1x32xf32>
    %21 = vector.broadcast %20 : vector<1x32xf32> to vector<16x32xf32>
    %22 = arith.mulf %19, %21 : vector<16x32xf32>
    %c0_8 = arith.constant 0 : index
    %c0_9 = arith.constant 0 : index
    %23 = vector.load %arg4[%c0_8, %c0_9] : memref<1x32xf32, #tpu.memory_space<vmem>>, vector<1x32xf32>
    %24 = vector.broadcast %23 : vector<1x32xf32> to vector<16x32xf32>
    %25 = arith.addf %22, %24 : vector<16x32xf32>
    %26 = arith.truncf %25 : vector<16x32xf32> to vector<16x32xbf16>
    %c0_10 = arith.constant 0 : index
    %c0_11 = arith.constant 0 : index
    %27 = vector.load %arg5[%c0_10, %c0_11] : memref<32x32xbf16, #tpu.memory_space<vmem>>, vector<32x32xbf16>
    %cst_12 = arith.constant dense<0.000000e+00> : vector<16x32xf32>
    %28 = tpu.matmul %26, %27, %cst_12 {dimension_numbers = #tpu.dot_dimension_numbers<[1], [0], [0], [1], [0, 0, 1, 1], [], []>} : vector<16x32xbf16>, vector<32x32xbf16>, vector<16x32xf32> -> vector<16x32xf32>
    %c0_13 = arith.constant 0 : index
    %c0_14 = arith.constant 0 : index
    %29 = vector.load %arg6[%c0_13, %c0_14] : memref<1x32xf32, #tpu.memory_space<vmem>>, vector<1x32xf32>
    %30 = vector.broadcast %29 : vector<1x32xf32> to vector<16x32xf32>
    %31 = arith.addf %28, %30 : vector<16x32xf32>
    %c0_15 = arith.constant 0 : index
    %c0_16 = arith.constant 0 : index
    %32 = vector.load %arg7[%c0_15, %c0_16] : memref<16x32xf32, #tpu.memory_space<vmem>>, vector<16x32xf32>
    tpu.vector_store %arg7[%c0_15, %c0_16], %31 {strides = array<i32>} : memref<16x32xf32, #tpu.memory_space<vmem>>, vector<16x32xf32>,
    %c0_17 = arith.constant 0 : index
    %c0_18 = arith.constant 0 : index
    %33 = vector.load %arg9[%c0_17, %c0_18] : memref<16x1xf32, #tpu.memory_space<vmem>>, vector<16x1xf32>
    %cst_19 = arith.constant dense<0xFF800000> : vector<16xf32>
    %34 = vector.multi_reduction <maximumf>, %31, %cst_19 [1] : vector<16x32xf32> to vector<16xf32>
    %35 = vector.shape_cast %34 : vector<16xf32> to vector<16x1xf32>
    %36 = arith.maximumf %33, %35 : vector<16x1xf32>
    %c0_20 = arith.constant 0 : index
    %c0_21 = arith.constant 0 : index
    %37 = vector.load %arg10[%c0_20, %c0_21] : memref<16x1xf32, #tpu.memory_space<vmem>>, vector<16x1xf32>
    %38 = arith.subf %33, %36 : vector<16x1xf32>
    %39 = math.exp %38 : vector<16x1xf32>
    %40 = arith.mulf %37, %39 : vector<16x1xf32>
    %41 = vector.broadcast %36 : vector<16x1xf32> to vector<16x32xf32>
    %42 = arith.subf %31, %41 : vector<16x32xf32>
    %43 = math.exp %42 : vector<16x32xf32>
    %cst_22 = arith.constant dense<0.000000e+00> : vector<16xf32>
    %44 = vector.multi_reduction <add>, %43, %cst_22 [1] : vector<16x32xf32> to vector<16xf32>
    %45 = vector.shape_cast %44 : vector<16xf32> to vector<16x1xf32>
    %46 = arith.addf %40, %45 : vector<16x1xf32>
    %c0_23 = arith.constant 0 : index
    %c0_24 = arith.constant 0 : index
    %47 = vector.load %arg10[%c0_23, %c0_24] : memref<16x1xf32, #tpu.memory_space<vmem>>, vector<16x1xf32>
    tpu.vector_store %arg10[%c0_23, %c0_24], %46 {strides = array<i32>} : memref<16x1xf32, #tpu.memory_space<vmem>>, vector<16x1xf32>,
    %c0_25 = arith.constant 0 : index
    %c0_26 = arith.constant 0 : index
    %48 = vector.load %arg9[%c0_25, %c0_26] : memref<16x1xf32, #tpu.memory_space<vmem>>, vector<16x1xf32>
    tpu.vector_store %arg9[%c0_25, %c0_26], %36 {strides = array<i32>} : memref<16x1xf32, #tpu.memory_space<vmem>>, vector<16x1xf32>,
    %c0_i32_27 = arith.constant 0 : i32
    %49 = arith.cmpi eq, %arg1, %c0_i32_27 : i32
    %50 = arith.extui %49 : i1 to i32
    %c0_i32_28 = arith.constant 0 : i32
    %51 = arith.cmpi ne, %50, %c0_i32_28 : i32
    scf.if %51 {
      %c0_29 = arith.constant 0 : index
      %c0_30 = arith.constant 0 : index
      %52 = vector.load %arg9[%c0_29, %c0_30] : memref<16x1xf32, #tpu.memory_space<vmem>>, vector<16x1xf32>
      %c0_31 = arith.constant 0 : index
      %c0_32 = arith.constant 0 : index
      %53 = vector.load %arg10[%c0_31, %c0_32] : memref<16x1xf32, #tpu.memory_space<vmem>>, vector<16x1xf32>
      %54 = math.log %53 : vector<16x1xf32>
      %55 = arith.addf %52, %54 : vector<16x1xf32>
      %c0_33 = arith.constant 0 : index
      %c0_34 = arith.constant 0 : index
      %56 = vector.load %arg8[%c0_33, %c0_34] : memref<16x1xf32, #tpu.memory_space<vmem>>, vector<16x1xf32>
      tpu.vector_store %arg8[%c0_33, %c0_34], %55 {strides = array<i32>} : memref<16x1xf32, #tpu.memory_space<vmem>>, vector<16x1xf32>,
    } else {
    }
    return
  }
  func.func @transform_0(%arg0: i32, %arg1: i32) -> (i32, i32) {
    %c0_i32 = arith.constant 0 : i32
    %c0_i32_0 = arith.constant 0 : i32
    return %arg0, %c0_i32 : i32, i32
  }
  func.func @transform_1(%arg0: i32, %arg1: i32) -> (i32, i32) {
    %c0_i32 = arith.constant 0 : i32
    %c0_i32_0 = arith.constant 0 : i32
    %c0_i32_1 = arith.constant 0 : i32
    return %c0_i32, %c0_i32_0 : i32, i32
  }
  func.func @transform_2(%arg0: i32, %arg1: i32) -> (i32, i32) {
    %c0_i32 = arith.constant 0 : i32
    %c0_i32_0 = arith.constant 0 : i32
    %c0_i32_1 = arith.constant 0 : i32
    return %c0_i32, %c0_i32_0 : i32, i32
  }
  func.func @transform_3(%arg0: i32, %arg1: i32) -> (i32, i32) {
    %c0_i32 = arith.constant 0 : i32
    %c0_i32_0 = arith.constant 0 : i32
    return %c0_i32, %arg1 : i32, i32
  }
  func.func @transform_4(%arg0: i32, %arg1: i32) -> (i32, i32) {
    %c0_i32 = arith.constant 0 : i32
    %c0_i32_0 = arith.constant 0 : i32
    return %c0_i32, %arg1 : i32, i32
  }
  func.func @transform_5(%arg0: i32, %arg1: i32) -> (i32, i32) {
    %c0_i32 = arith.constant 0 : i32
    return %arg0, %arg1 : i32, i32
  }
  func.func @transform_6(%arg0: i32, %arg1: i32) -> (i32, i32) {
    %c0_i32 = arith.constant 0 : i32
    %c0_i32_0 = arith.constant 0 : i32
    return %arg0, %c0_i32 : i32, i32
  }
}

</mosaic_0001>

<bundles_post_ra>
// kernel: encoder_decoder_forward.45
= control target key start
LH: loop header
LB: loop body
LE: loop exit
PB: predicated region body
PF: predicated region fallthrough
CT: control target
= control target key end

     0   :  { %s356_s9 = smov 0   ;;  %s358_s10 = smov 0   ;;  %s380_s0 = inlined_call_operand.vmem [shape: f32[2,8,32], index: 0, kind: input, shape index: {}]   ;;  %s381_s1 = inlined_call_operand.vmem [shape: f32[8,32], index: 1, kind: input, shape index: {}]   ;;  %s382_s2 = inlined_call_operand.vmem [shape: f32[2,8,32], index: 2, kind: output, shape index: {}]  }
   0x1   :  { %s360_s11 = smov 0  }
   0x2 LB: > { %s24_s12 = sadd.s32 1, %s335_s10  ;;  %p288_p0 = scmp.ge.s32.totalorder %s339_s11, 1  ;;  %s339_s11 = sphi %s360_s11, %s12_s11   ;;  %s335_s10 = sphi %s358_s10, %s384_s10   ;;  %s331_s9 = sphi %s356_s9, %s383_s9  }
   0x3   : > { %p26_p1 = scmp.ge.s32.totalorder %s24_s12, 2  ;;  %p139_p2 = scmp.lt.s32.totalorder %s339_s11, 3 }
   0x5   : > { %s386_s12 = smov (%p26_p1, %s24_s12), 0  ;;  %p140_p3 = pnand %p288_p0, %p139_p2 }
   0x6   : > { %p169_p4 = scmp.lt.s32.totalorder (!%p140_p3), %s331_s9, 1  ;;  %v189_v1 = vld [vmem:[%s381_s1] sm:$0xff] (!%p140_p3)  ;;  %vm191_vm0 = vcmask (!%p140_p3), 261120  }
   0x7   : > { %143 = sbr.rel (%p140_p3) target bundleno = 23 (0x17), region = 28 }
   0xe   : > { %s388_s9 = smov (!%p169_p4, %s331_s9), 1 }
   0xf   : > { %s289_s13 = sshll.u32 %s388_s9, 3 }
  0x10   : > { %s175_s16 = scalar_lea.vmem %s380_s0, %s289_s13  ;;  %s186_s21 = scalar_lea.vmem %s382_s2, %s289_s13 }
  0x11   : > { %v187_v0 = vld [vmem:[%s175_s16] sm:$0xff] }
  0x12   : > { %v188_v2 = vmul.f32 5.656854, %v187_v0 }
  0x14   : > { %v190_v3 = vadd.f32 %v189_v1, %v188_v2 }
  0x16   : > { %192 = vst.msk [vmem:[%s186_s21] sm:$0xff] %vm191_vm0, %v190_v3 }
  0x17 PF: > { %s12_s11 = sadd.s32 1, %s339_s11   ;;  %s383_s9 = smov %s335_s10 }
  0x18   : > { %p9_p5 = scmp.ge.s32.totalorder %s12_s11, 4   ;;  %s384_s10 = smov %s386_s12 }
  0x1a   :  { %11 = sbr.rel (!%p9_p5) target bundleno = 2 (0x2), region = 61 }

// kernel: encoder_decoder_forward.46
= control target key start
LH: loop header
LB: loop body
LE: loop exit
PB: predicated region body
PF: predicated region fallthrough
CT: control target
= control target key end

     0   :  { %vm23_vm0 = vcmask 261120   ;;  %v181_v15 = vmov 0.0   ;;  %vm182_vm1 = vmmov 0   ;;  %vm145_vm2 = vcmask 781312   ;;  %s245_s0 = inlined_call_operand.vmem [shape: f32[16,32], index: 0, kind: input, shape index: {}]   ;;  %s246_s3 = inlined_call_operand.vmem [shape: bf16[32,96], index: 3, kind: input, shape index: {}]   ;;  %s247_s1 = inlined_call_operand.vmem [shape: f32[1,32], index: 1, kind: input, shape index: {}]   ;;  %s248_s2 = inlined_call_operand.vmem [shape: f32[1,32], index: 2, kind: input, shape index: {}]   ;;  %s249_s4 = inlined_call_operand.vmem [shape: f32[1,96], index: 4, kind: input, shape index: {}]   ;;  %s250_s5 = inlined_call_operand.vmem [shape: bf16[16,96], index: 5, kind: output, shape index: {}]  }
   0x1   :  { %v21_v0 = vld [vmem:[%s245_s0] sm:$0xff]  ;;  %v22_v1 = vld [vmem:[%s245_s0 + $0x8] sm:$0xff]  ;;  %165 = vmatprep.subr.bf16.mxu0 %v181_v15  ;;  %169 = vmatprep.mubr.msk.bf16.mxu0 %vm182_vm1, %v181_v15 }
   0x2   :  { %v24_v2 = vsel %vm23_vm0, %v21_v0, 0.0  ;;  %v27_v3 = vsel %vm23_vm0, %v22_v1, 0.0  ;;  %v175_v14 = vld [vmem:[%s246_s3] sm:$0xff]   ;;  %v176_v16 = vld [vmem:[%s246_s3 + $0x8] sm:$0xff]  }
   0x3   :  { %25 = vadd.xlane.f32.xlu0 %v24_v2  ;;  %166 = vmatpush3.bf16.msra.mxu0 %v175_v14  ;;  %v152_v25 = vld [vmem:[%s247_s1] ss:$0 sm:$0xff] }
   0x4   :  { %167 = vmatprep.subr.bf16.mxu0 %v181_v15  ;;  %v153_v29 = vld [vmem:[%s248_s2] ss:$0 sm:$0xff] }
   0x5   :  { %v154_v34 = vld [vmem:[%s249_s4] ss:$0 sm:$0xff] }
   0x7   :  { %28 = vadd.xlane.f32.xlu0 %v27_v3  ;;  %168 = vmatpush3.bf16.msra.mxu0 %v176_v16 }
  0x90   :  { %v26_v4 = vpop.xlane.xlu0 %25 }
  0x91   :  { %v31_v5 = vmul.f32 0.03125, %v26_v4 }
  0x93   :  { %v33_v6 = vsub.f32 %v21_v0, %v31_v5 }
  0x94   :  { %v29_v7 = vpop.xlane.xlu0 %28 }
  0x95   :  { %v32_v8 = vmul.f32 0.03125, %v29_v7  ;;  %v35_v9 = vmul.f32 %v33_v6, %v33_v6 }
  0x97   :  { %v34_v10 = vsub.f32 %v22_v1, %v32_v8  ;;  %v37_v11 = vsel %vm23_vm0, %v35_v9, 0.0 }
  0x98   :  { %38 = vadd.xlane.f32.xlu1 %v37_v11 }
  0x99   :  { %v36_v12 = vmul.f32 %v34_v10, %v34_v10 }
  0x9b   :  { %v40_v13 = vsel %vm23_vm0, %v36_v12, 0.0 }
  0x9c   :  { %41 = vadd.xlane.f32.xlu1 %v40_v13 }
 0x125   :  { %v39_v17 = vpop.xlane.xlu1 %38 }
 0x126   :  { %v43_v18 = vmul.f32 0.03125, %v39_v17 }
 0x128   :  { %v45_v19 = vadd.f32 1e-06, %v43_v18 }
 0x129   :  { %v42_v20 = vpop.xlane.xlu1 %41 }
 0x12a   :  { %177 = vrsqrt.f32 %v45_v19  ;;  %v44_v21 = vmul.f32 0.03125, %v42_v20 }
 0x12c   :  { %v46_v22 = vadd.f32 1e-06, %v44_v21 }
 0x12e   :  { %179 = vrsqrt.f32 %v46_v22 }
 0x134   :  { %v178_v23 = vpop.eup %177 }
 0x135   :  { %v49_v24 = vmul.f32 %v178_v23, %v33_v6 }
 0x137   :  { %v58_v28 = vmul.f32 %v152_v25, %v49_v24 }
 0x138   :  { %v180_v26 = vpop.eup %179 }
 0x139   :  { %v50_v27 = vmul.f32 %v180_v26, %v34_v10  ;;  %v67_v31 = vadd.f32 %v153_v29, %v58_v28 }
 0x13b   :  { %v59_v30 = vmul.f32 %v152_v25, %v50_v27 }
 0x13d   :  { %v68_v32 = vadd.f32 %v153_v29, %v59_v30 }
 0x13f   :  { %v69_v33 = vpack.c.bf16 %v68_v32, %v67_v31 }
 0x141   :  { %170 = vmatmul.mubr.msk.bf16.vlgmr.msra.gmra.mrb[0].mxu0 %vm23_vm0, %v69_v33 }
 0x214   :  { %v130_v35 = vpop.f32.mrb[0].mxu0 }
 0x215   :  { %v131_v36 = vadd.f32 %v154_v34, %v130_v35  ;;  %v171_v37 = vpop.f32.mrb[1].mxu0 }
 0x216   :  { %v133_v38 = vpop.f32.mrb[2].mxu0 }
 0x217   :  { %v160_v39 = vpack.c.bf16 %v131_v36, %v131_v36  ;;  %v134_v40 = vadd.f32 %v154_v34, %v133_v38  ;;  %v172_v41 = vpop.f32.mrb[3].mxu0 }
 0x219   :  { %146 = vst.msk [vmem:[%s250_s5] sm:$0xf] %vm145_vm2, %v160_v39  ;;  %v161_v42 = vpack.c.bf16 %v134_v40, %v134_v40 }
 0x21b   :  { %147 = vst.msk [vmem:[%s250_s5 + $0x4] sm:$0xf] %vm145_vm2, %v161_v42 }

// kernel: encoder_decoder_forward.48
= control target key start
LH: loop header
LB: loop body
LE: loop exit
PB: predicated region body
PF: predicated region fallthrough
CT: control target
= control target key end

     0   :  { %v124_v0 = vmov 0.0   ;;  %vm125_vm0 = vmmov 0   ;;  %vm48_vm1 = vcmask 261120   ;;  %s178_s1 = inlined_call_operand.vmem [shape: bf16[32,32], index: 1, kind: input, shape index: {}]   ;;  %s179_s0 = inlined_call_operand.vmem [shape: bf16[16,32], index: 0, kind: input, shape index: {}]   ;;  %s180_s2 = inlined_call_operand.vmem [shape: f32[1,32], index: 2, kind: input, shape index: {}]   ;;  %s181_s3 = inlined_call_operand.vmem [shape: f32[16,32], index: 3, kind: input, shape index: {}]   ;;  %s182_s4 = inlined_call_operand.vmem [shape: f32[16,32], index: 4, kind: output, shape index: {}]  }
   0x1   :  { %111 = vmatprep.subr.bf16.mxu0 %v124_v0  ;;  %v121_v1 = vld [vmem:[%s178_s1] sm:$0xff]   ;;  %115 = vmatprep.mubr.msk.bf16.mxu0 %vm125_vm0, %v124_v0  ;;  %v122_v2 = vld [vmem:[%s178_s1 + $0x8] sm:$0xff]  }
   0x2   :  { %112 = vmatpush3.bf16.msra.mxu0 %v121_v1  ;;  %v123_v3 = vld [vmem:[%s179_s0] sm:$0xff]   ;;  %v94_v10 = vld [vmem:[%s181_s3 + $0x8] sm:$0xff] }
   0x3   :  { %113 = vmatprep.subr.bf16.mxu0 %v124_v0  ;;  %v103_v4 = vld [vmem:[%s180_s2] ss:$0 sm:$0xff] }
   0x4   :  { %v93_v6 = vld [vmem:[%s181_s3] sm:$0xff] }
   0x6   :  { %114 = vmatpush3.bf16.msra.mxu0 %v122_v2 }
   0x9   :  { %116 = vmatmul.mubr.msk.bf16.vlgmr.msra.gmra.mrb[0].mxu0 %vm48_vm1, %v123_v3 }
  0xdc   :  { %v86_v5 = vpop.f32.mrb[0].mxu0 }
  0xdd   :  { %v87_v7 = vadd.f32 %v103_v4, %v86_v5  ;;  %v117_v8 = vpop.f32.mrb[1].mxu0 }
  0xde   :  { %v89_v9 = vpop.f32.mrb[2].mxu0 }
  0xdf   :  { %v95_v11 = vadd.f32 %v93_v6, %v87_v7  ;;  %v90_v12 = vadd.f32 %v103_v4, %v89_v9  ;;  %v118_v13 = vpop.f32.mrb[3].mxu0 }
  0xe1   :  { %97 = vst.msk [vmem:[%s182_s4] sm:$0xff] %vm48_vm1, %v95_v11  ;;  %v96_v14 = vadd.f32 %v94_v10, %v90_v12 }
  0xe3   :  { %98 = vst.msk [vmem:[%s182_s4 + $0x8] sm:$0xff] %vm48_vm1, %v96_v14 }

// kernel: encoder_decoder_forward.47
= control target key start
LH: loop header
LB: loop body
LE: loop exit
PB: predicated region body
PF: predicated region fallthrough
CT: control target
= control target key end

     0   :  { %s810_s15 = smov 0   ;;  %s812_s16 = smov 0   ;;  %s887_s0 = inlined_call_operand.vmem [shape: f32[2,8,8], index: 0, kind: input, shape index: {}]   ;;  %s888_s1 = inlined_call_operand.vmem [shape: bf16[2,4,8,8], index: 1, kind: input, shape index: {}]   ;;  %s889_s2 = inlined_call_operand.vmem [shape: bf16[2,4,8,8], index: 2, kind: input, shape index: {}]   ;;  %s890_s3 = inlined_call_operand.vmem [shape: bf16[2,4,8,8], index: 3, kind: input, shape index: {}]   ;;  %s891_s4 = inlined_call_operand.vmem [shape: bf16[2,4,8,8], index: 4, kind: output, shape index: {}]  }
   0x1   :  { %s814_s17 = smov 0   ;;  %s816_s18 = smov 0  }
   0x2   :  { %s818_s19 = smov 0  }
   0x3 LB: > { %s29_s20 = sadd.s32 1, %s771_s17  ;;  %s33_s21 = sadd.s32 1, %s775_s18  ;;  %s779_s19 = sphi %s818_s19, %s14_s19   ;;  %s775_s18 = sphi %s816_s18, %s895_s18   ;;  %s771_s17 = sphi %s814_s17, %s894_s17   ;;  %s767_s16 = sphi %s812_s16, %s893_s16   ;;  %s763_s15 = sphi %s810_s15, %s892_s15  }
   0x4   : > { %p31_p0 = scmp.ge.s32.totalorder %s29_s20, 4  ;;  %p659_p1 = scmp.ge.s32.totalorder %s779_s19, 1 }
   0x5   : > { %p242_p2 = scmp.lt.s32.totalorder %s779_s19, 9 }
   0x6   : > { %s897_s20 = smov (%p31_p0, %s29_s20), 0  ;;  %s899_s21 = smov (!%p31_p0, %s33_s21), %s775_s18 }
   0x7   : > { %p243_p3 = pnand %p659_p1, %p242_p2  ;;  %p35_p4 = scmp.ge.s32.totalorder %s899_s21, 2 }
   0x8   : > { %p303_p5 = scmp.lt.s32.totalorder (!%p243_p3), %s767_s16, 1  ;;  %p312_p6 = scmp.lt.s32.totalorder (!%p243_p3), %s763_s15, 3  ;;  %vm356_vm0 = vcmask (!%p243_p3), 64512   ;;  %v781_v0 = vmov (!%p243_p3), 0.0   ;;  %vm782_vm1 = vmmov (!%p243_p3), 0   ;;  %vm353_vm2 = vcmask (!%p243_p3), 7168  }
   0x9   : > { %s901_s21 = smov (%p35_p4, %s899_s21), 0  ;;  %246 = sbr.rel (%p243_p3) target bundleno = 830 (0x33e), region = 36 }
   0xa   : > { %677 = vmatprep.subr.bf16.mxu0 (!%p243_p3), %v781_v0  ;;  %357 = vst.msk [vmem:[#allocation4] sm:$0xff] (!%p243_p3), %vm356_vm0, %v781_v0  ;;  %679 = vmatprep.mubr.msk.bf16.mxu0 (!%p243_p3), %vm782_vm1, %v781_v0  ;;  %v783_v4 = vmov (!%p243_p3), -inf   ;;  %v784_v13 = vmov (!%p243_p3), 0   ;;  %vm447_vm4 = vcmask (!%p243_p3), 1043456   ;;  %vm507_vm5 = vcmask (!%p243_p3), 60416  }
   0xb   : > { %683 = vmatprep.subr.bf16.mxu1 (!%p243_p3), %v781_v0  ;;  %685 = vmatprep.mubr.msk.bf16.mxu1 (!%p243_p3), %vm782_vm1, %v781_v0  ;;  %354 = vst.msk [vmem:[#allocation2] sm:$0xff] (!%p243_p3), %vm353_vm2, %v783_v4  ;;  %355 = vst.msk [vmem:[#allocation3] sm:$0xff] (!%p243_p3), %vm353_vm2, %v781_v0 }
   0xc   : > { %733 = vset.pattern.permute.xlu0 (!%p243_p3), %v784_v13  ;;  %734 = vset.pattern.permute.xlu1 (!%p243_p3), %v784_v13 }
  0x10   : > { %s903_s16 = smov (!%p303_p5, %s767_s16), 1  ;;  %s905_s15 = smov (!%p312_p6, %s763_s15), 3 }
  0x11   : > { %s661_s22 = sshll.u32 %s903_s16, 2  ;;  %s660_s5 = sshll.u32 %s903_s16, 3  ;;  %v435_v34 = vld [vmem:[#allocation4] sm:$0xff] }
  0x12   : > { %s315_s23 = sadd.s32 %s661_s22, %s905_s15  ;;  %s309_s8 = scalar_lea.vmem %s887_s0, %s660_s5  ;;  %v411_v14 = vld [vmem:[#allocation2] sm:$0xff]  ;;  %v427_v28 = vld [vmem:[#allocation3] sm:$0xff] }
  0x13   : > { %s841_s24 = sshll.u32 %s315_s23, 2  ;;  %v408_v5 = vld [vmem:[%s309_s8] sm:$0xff] }
  0x14   : > { %s328_s27 = scalar_lea.vmem %s889_s2, %s841_s24  ;;  %s317_s30 = scalar_lea.vmem %s888_s1, %s841_s24  ;;  %vm409_vm3 = vcmp.gt.f32.partialorder %v408_v5, 0.0 }
  0x15   : > { %v359_v1 = vld [vmem:[%s328_s27] sm:$0xf]  ;;  %s339_s11 = scalar_lea.vmem %s890_s3, %s841_s24  ;;  %s347_s14 = scalar_lea.vmem %s891_s4, %s841_s24 }
  0x16   : > { %v365_v2 = vsel %vm356_vm0, %v359_v1, 0  ;;  %v358_v3 = vld [vmem:[%s317_s30] sm:$0xf] }
  0x17   : > { %678 = vmatpush3.bf16.xpose.msra.mxu0 %v365_v2  ;;  %v443_v18 = vld [vmem:[%s339_s11] sm:$0xf] }
  0x18   : > { %v449_v19 = vsel %vm447_vm4, %v443_v18, 0 }
  0x19   : > { %684 = vmatpush3.bf16.msra.mxu1 %v449_v19 }
  0x1e   : > { %680 = vmatmul.mubr.msk.bf16.vlgmr.msra.gmra.mrb[0].mxu0 %vm356_vm0, %v358_v3 }
  0xf1   : > { %v401_v6 = vpop.f32.mrb[0].mxu0 }
  0xf2   : > { %v407_v7 = vmul.f32 0.35355338, %v401_v6  ;;  %v681_v8 = vpop.f32.mrb[1].mxu0 }
  0xf3   : > { %v404_v9 = vpop.f32.mrb[2].mxu0 }
  0xf4   : > { %v682_v10 = vpop.f32.mrb[3].mxu0  ;;  %v410_v11 = vsel %vm409_vm3, %v407_v7, -1e+09 }
  0xf5   : > { %v412_v12 = vsel %vm356_vm0, %v410_v11, -inf }
  0xf6   : > { %413 = vmax.xlane.f32.xlu0 %v412_v12 }
 0x183   : > { %v414_v15 = vpop.xlane.xlu0 %413 }
 0x184   : > { %v415_v16 = vmax.f32 %v411_v14, %v414_v15 }
 0x186   : > { %v416_v17 = vsub.f32 %v411_v14, %v415_v16  ;;  %493 = vst.msk [vmem:[#allocation2] sm:$0xff] %vm353_vm2, %v415_v16  ;;  %421 = vperm.xlu0 %733, %v415_v16  }
 0x188   : > { %v417_v26 = vmul.f32 1.442695, %v416_v17 }
 0x205   : > { %v422_v20 = vpop.permute.xlu0 %421 }
 0x206   : > { %v424_v21 = vsub.f32 %v410_v11, %v422_v20 }
 0x208   : > { %v425_v22 = vmul.f32 1.442695, %v424_v21 }
 0x20a   : > { %735 = vpow2.f32 %v425_v22 }
 0x20b   : > { %737 = vpow2.f32 %v417_v26 }
 0x214   : > { %v736_v23 = vpop.eup %735 }
 0x215   : > { %v429_v24 = vsel %vm356_vm0, %v736_v23, 0.0  ;;  %v442_v25 = vpack.c.bf16 %v736_v23, %v736_v23  ;;  %v738_v27 = vpop.eup %737 }
 0x216   : > { %430 = vadd.xlane.f32.xlu1 %v429_v24  ;;  %v428_v29 = vmul.f32 %v738_v27, %v427_v28 }
 0x217   : > { %686 = vmatmul.mubr.msk.bf16.vlgmr.msra.gmra.mrb[0].mxu1 %vm356_vm0, %v442_v25 }
 0x227   : > { %438 = vperm.xlu1 %734, %v738_v27  }
 0x2a3   : > { %v431_v30 = vpop.xlane.xlu1 %430 }
 0x2a4   : > { %v432_v31 = vadd.f32 %v431_v30, %v428_v29 }
 0x2a6   : > { %434 = vst.msk [vmem:[#allocation3] sm:$0xff] %vm353_vm2, %v432_v31 }
 0x2a7   : > { %v439_v35 = vpop.permute.xlu1 %438 }
 0x2a8   : > { %v441_v36 = vmul.f32 %v439_v35, %v435_v34 }
 0x2ad   : > { %v498_v32 = vld [vmem:[#allocation3] sm:$0xff] }
 0x2ae   : > { %739 = vrcp.f32 %v498_v32 }
 0x2b8   : > { %v740_v33 = vpop.eup %739 }
 0x2b9   : > { %502 = vperm.xlu1 %734, %v740_v33  }
 0x2ea   : > { %v485_v37 = vpop.f32.mrb[0].mxu1 }
 0x2eb   : > { %v491_v38 = vadd.f32 %v485_v37, %v441_v36  ;;  %v687_v39 = vpop.f32.mrb[1].mxu1 }
 0x2ec   : > { %v488_v40 = vpop.f32.mrb[2].mxu1 }
 0x2ed   : > { %492 = vst.msk [vmem:[#allocation4] sm:$0xff] %vm356_vm0, %v491_v38  ;;  %v688_v41 = vpop.f32.mrb[3].mxu1 }
 0x2f4   : > { %v497_v42 = vld [vmem:[#allocation4] sm:$0xff] }
 0x338   : > { %v503_v43 = vpop.permute.xlu1 %502 }
 0x339   : > { %v505_v44 = vmul.f32 %v503_v43, %v497_v42 }
 0x33b   : > { %v506_v45 = vpack.c.bf16 %v505_v44, %v505_v44 }
 0x33d   : > { %508 = vst.msk [vmem:[%s347_s14] sm:$0xf] %vm507_vm5, %v506_v45 }
 0x33e PF: > { %s14_s19 = sadd.s32 1, %s779_s19   ;;  %s892_s15 = smov %s771_s17 }
 0x33f   : > { %p11_p7 = scmp.ge.s32.totalorder %s14_s19, 10   ;;  %s893_s16 = smov %s775_s18 }
 0x340   : > { %s894_s17 = smov %s897_s20  ;;  %s895_s18 = smov %s901_s21 }
 0x341   :  { %13 = sbr.rel (!%p11_p7) target bundleno = 3 (0x3), region = 83 }

// kernel: encoder_decoder_forward.49
= control target key start
LH: loop header
LB: loop body
LE: loop exit
PB: predicated region body
PF: predicated region fallthrough
CT: control target
= control target key end

     0   :  { %vm23_vm0 = vcmask 261120   ;;  %v181_v15 = vmov 0.0   ;;  %vm182_vm1 = vmmov 0   ;;  %vm145_vm2 = vcmask 257024   ;;  %s245_s0 = inlined_call_operand.vmem [shape: f32[16,32], index: 0, kind: input, shape index: {}]   ;;  %s246_s3 = inlined_call_operand.vmem [shape: bf16[32,32], index: 3, kind: input, shape index: {}]   ;;  %s247_s1 = inlined_call_operand.vmem [shape: f32[1,32], index: 1, kind: input, shape index: {}]   ;;  %s248_s2 = inlined_call_operand.vmem [shape: f32[1,32], index: 2, kind: input, shape index: {}]   ;;  %s249_s4 = inlined_call_operand.vmem [shape: f32[1,32], index: 4, kind: input, shape index: {}]   ;;  %s250_s5 = inlined_call_operand.vmem [shape: bf16[16,32], index: 5, kind: output, shape index: {}]  }
   0x1   :  { %v21_v0 = vld [vmem:[%s245_s0] sm:$0xff]  ;;  %v22_v1 = vld [vmem:[%s245_s0 + $0x8] sm:$0xff]  ;;  %165 = vmatprep.subr.bf16.mxu0 %v181_v15  ;;  %169 = vmatprep.mubr.msk.bf16.mxu0 %vm182_vm1, %v181_v15 }
   0x2   :  { %v24_v2 = vsel %vm23_vm0, %v21_v0, 0.0  ;;  %v27_v3 = vsel %vm23_vm0, %v22_v1, 0.0  ;;  %v175_v14 = vld [vmem:[%s246_s3] sm:$0xff]   ;;  %v176_v16 = vld [vmem:[%s246_s3 + $0x8] sm:$0xff]  }
   0x3   :  { %25 = vadd.xlane.f32.xlu0 %v24_v2  ;;  %166 = vmatpush3.bf16.msra.mxu0 %v175_v14  ;;  %v152_v25 = vld [vmem:[%s247_s1] ss:$0 sm:$0xff] }
   0x4   :  { %167 = vmatprep.subr.bf16.mxu0 %v181_v15  ;;  %v153_v29 = vld [vmem:[%s248_s2] ss:$0 sm:$0xff] }
   0x5   :  { %v154_v34 = vld [vmem:[%s249_s4] ss:$0 sm:$0xff] }
   0x7   :  { %28 = vadd.xlane.f32.xlu0 %v27_v3  ;;  %168 = vmatpush3.bf16.msra.mxu0 %v176_v16 }
  0x90   :  { %v26_v4 = vpop.xlane.xlu0 %25 }
  0x91   :  { %v31_v5 = vmul.f32 0.03125, %v26_v4 }
  0x93   :  { %v33_v6 = vsub.f32 %v21_v0, %v31_v5 }
  0x94   :  { %v29_v7 = vpop.xlane.xlu0 %28 }
  0x95   :  { %v32_v8 = vmul.f32 0.03125, %v29_v7  ;;  %v35_v9 = vmul.f32 %v33_v6, %v33_v6 }
  0x97   :  { %v34_v10 = vsub.f32 %v22_v1, %v32_v8  ;;  %v37_v11 = vsel %vm23_vm0, %v35_v9, 0.0 }
  0x98   :  { %38 = vadd.xlane.f32.xlu1 %v37_v11 }
  0x99   :  { %v36_v12 = vmul.f32 %v34_v10, %v34_v10 }
  0x9b   :  { %v40_v13 = vsel %vm23_vm0, %v36_v12, 0.0 }
  0x9c   :  { %41 = vadd.xlane.f32.xlu1 %v40_v13 }
 0x125   :  { %v39_v17 = vpop.xlane.xlu1 %38 }
 0x126   :  { %v43_v18 = vmul.f32 0.03125, %v39_v17 }
 0x128   :  { %v45_v19 = vadd.f32 1e-06, %v43_v18 }
 0x129   :  { %v42_v20 = vpop.xlane.xlu1 %41 }
 0x12a   :  { %177 = vrsqrt.f32 %v45_v19  ;;  %v44_v21 = vmul.f32 0.03125, %v42_v20 }
 0x12c   :  { %v46_v22 = vadd.f32 1e-06, %v44_v21 }
 0x12e   :  { %179 = vrsqrt.f32 %v46_v22 }
 0x134   :  { %v178_v23 = vpop.eup %177 }
 0x135   :  { %v49_v24 = vmul.f32 %v178_v23, %v33_v6 }
 0x137   :  { %v58_v28 = vmul.f32 %v152_v25, %v49_v24 }
 0x138   :  { %v180_v26 = vpop.eup %179 }
 0x139   :  { %v50_v27 = vmul.f32 %v180_v26, %v34_v10  ;;  %v67_v31 = vadd.f32 %v153_v29, %v58_v28 }
 0x13b   :  { %v59_v30 = vmul.f32 %v152_v25, %v50_v27 }
 0x13d   :  { %v68_v32 = vadd.f32 %v153_v29, %v59_v30 }
 0x13f   :  { %v69_v33 = vpack.c.bf16 %v68_v32, %v67_v31 }
 0x141   :  { %170 = vmatmul.mubr.msk.bf16.vlgmr.msra.gmra.mrb[0].mxu0 %vm23_vm0, %v69_v33 }
 0x214   :  { %v130_v35 = vpop.f32.mrb[0].mxu0 }
 0x215   :  { %v131_v36 = vadd.f32 %v154_v34, %v130_v35  ;;  %v171_v37 = vpop.f32.mrb[1].mxu0 }
 0x216   :  { %v133_v38 = vpop.f32.mrb[2].mxu0 }
 0x217   :  { %v160_v39 = vpack.c.bf16 %v131_v36, %v131_v36  ;;  %v134_v40 = vadd.f32 %v154_v34, %v133_v38  ;;  %v172_v41 = vpop.f32.mrb[3].mxu0 }
 0x219   :  { %146 = vst.msk [vmem:[%s250_s5] sm:$0xf] %vm145_vm2, %v160_v39  ;;  %v161_v42 = vpack.c.bf16 %v134_v40, %v134_v40 }
 0x21b   :  { %147 = vst.msk [vmem:[%s250_s5 + $0x4] sm:$0xf] %vm145_vm2, %v161_v42 }

// kernel: encoder_decoder_forward.38
= control target key start
LH: loop header
LB: loop body
LE: loop exit
PB: predicated region body
PF: predicated region fallthrough
CT: control target
= control target key end

     0   :  { %v151_v0 = vmov 0.0   ;;  %vm152_vm0 = vmmov 0   ;;  %vm64_vm1 = vcmask 523264   ;;  %vm113_vm2 = vcmask 261120   ;;  %s208_s1 = inlined_call_operand.vmem [shape: bf16[64,32], index: 1, kind: input, shape index: {}]   ;;  %s209_s0 = inlined_call_operand.vmem [shape: bf16[16,64], index: 0, kind: input, shape index: {}]   ;;  %s210_s2 = inlined_call_operand.vmem [shape: f32[1,32], index: 2, kind: input, shape index: {}]   ;;  %s211_s3 = inlined_call_operand.vmem [shape: f32[16,32], index: 3, kind: input, shape index: {}]   ;;  %s212_s4 = inlined_call_operand.vmem [shape: f32[16,32], index: 4, kind: output, shape index: {}]  }
   0x1   :  { %132 = vmatprep.subr.bf16.mxu0 %v151_v0  ;;  %v146_v1 = vld [vmem:[%s208_s1] sm:$0xff]   ;;  %140 = vmatprep.mubr.msk.bf16.mxu0 %vm152_vm0, %v151_v0  ;;  %v147_v2 = vld [vmem:[%s208_s1 + $0x8] sm:$0xff]   ;;  %v148_v3 = vld [vmem:[%s208_s1 + $0x10] sm:$0xff]  }
   0x2   :  { %133 = vmatpush3.bf16.msra.mxu0 %v146_v1  ;;  %v149_v4 = vld [vmem:[%s208_s1 + $0x18] sm:$0xff]   ;;  %v150_v5 = vld [vmem:[%s209_s0] sm:$0xff]   ;;  %v110_v12 = vld [vmem:[%s211_s3 + $0x8] sm:$0xff] }
   0x3   :  { %134 = vmatprep.subr.bf16.mxu0 %v151_v0  ;;  %v120_v6 = vld [vmem:[%s210_s2] ss:$0 sm:$0xff] }
   0x4   :  { %v109_v8 = vld [vmem:[%s211_s3] sm:$0xff] }
   0x6   :  { %135 = vmatpush3.bf16.msra.mxu0 %v147_v2 }
   0x7   :  { %136 = vmatprep.subr.bf16.mxu0 %v151_v0 }
   0xa   :  { %137 = vmatpush3.bf16.msra.mxu0 %v148_v3 }
   0xb   :  { %138 = vmatprep.subr.bf16.mxu0 %v151_v0 }
   0xe   :  { %139 = vmatpush3.bf16.msra.mxu0 %v149_v4 }
  0x11   :  { %141 = vmatmul.mubr.msk.bf16.vlgmr.msra.gmra.mrb[0].mxu0 %vm64_vm1, %v150_v5 }
  0xe4   :  { %v102_v7 = vpop.f32.mrb[0].mxu0 }
  0xe5   :  { %v103_v9 = vadd.f32 %v120_v6, %v102_v7  ;;  %v142_v10 = vpop.f32.mrb[1].mxu0 }
  0xe6   :  { %v105_v11 = vpop.f32.mrb[2].mxu0 }
  0xe7   :  { %v111_v13 = vadd.f32 %v109_v8, %v103_v9  ;;  %v106_v14 = vadd.f32 %v120_v6, %v105_v11  ;;  %v143_v15 = vpop.f32.mrb[3].mxu0 }
  0xe9   :  { %114 = vst.msk [vmem:[%s212_s4] sm:$0xff] %vm113_vm2, %v111_v13  ;;  %v112_v16 = vadd.f32 %v110_v12, %v106_v14 }
  0xeb   :  { %115 = vst.msk [vmem:[%s212_s4 + $0x8] sm:$0xff] %vm113_vm2, %v112_v16 }

// kernel: encoder_decoder_forward.35
= control target key start
LH: loop header
LB: loop body
LE: loop exit
PB: predicated region body
PF: predicated region fallthrough
CT: control target
= control target key end

     0   :  { %s809_s15 = smov 0   ;;  %s811_s16 = smov 0   ;;  %s886_s0 = inlined_call_operand.vmem [shape: f32[2,1,8], index: 0, kind: input, shape index: {}]   ;;  %s887_s1 = inlined_call_operand.vmem [shape: bf16[2,4,8,8], index: 1, kind: input, shape index: {}]   ;;  %s888_s2 = inlined_call_operand.vmem [shape: bf16[2,4,8,8], index: 2, kind: input, shape index: {}]   ;;  %s889_s3 = inlined_call_operand.vmem [shape: bf16[2,4,8,8], index: 3, kind: input, shape index: {}]   ;;  %s890_s4 = inlined_call_operand.vmem [shape: bf16[2,4,8,8], index: 4, kind: output, shape index: {}]  }
   0x1   :  { %s813_s17 = smov 0   ;;  %s815_s18 = smov 0  }
   0x2   :  { %s817_s19 = smov 0  }
   0x3 LB: > { %s29_s20 = sadd.s32 1, %s770_s17  ;;  %s33_s21 = sadd.s32 1, %s774_s18  ;;  %s778_s19 = sphi %s817_s19, %s14_s19   ;;  %s774_s18 = sphi %s815_s18, %s894_s18   ;;  %s770_s17 = sphi %s813_s17, %s893_s17   ;;  %s766_s16 = sphi %s811_s16, %s892_s16   ;;  %s762_s15 = sphi %s809_s15, %s891_s15  }
   0x4   : > { %p31_p0 = scmp.ge.s32.totalorder %s29_s20, 4  ;;  %p659_p1 = scmp.ge.s32.totalorder %s778_s19, 1 }
   0x5   : > { %p241_p2 = scmp.lt.s32.totalorder %s778_s19, 9 }
   0x6   : > { %s896_s20 = smov (%p31_p0, %s29_s20), 0  ;;  %s898_s21 = smov (!%p31_p0, %s33_s21), %s774_s18 }
   0x7   : > { %p242_p3 = pnand %p659_p1, %p241_p2  ;;  %p35_p4 = scmp.ge.s32.totalorder %s898_s21, 2 }
   0x8   : > { %p301_p5 = scmp.lt.s32.totalorder (!%p242_p3), %s766_s16, 1  ;;  %p309_p6 = scmp.lt.s32.totalorder (!%p242_p3), %s762_s15, 3  ;;  %vm353_vm0 = vcmask (!%p242_p3), 64512   ;;  %v780_v0 = vmov (!%p242_p3), 0.0   ;;  %vm781_vm1 = vmmov (!%p242_p3), 0   ;;  %v782_v4 = vmov (!%p242_p3), 0  }
   0x9   : > { %s900_s21 = smov (%p35_p4, %s898_s21), 0  ;;  %245 = sbr.rel (%p242_p3) target bundleno = 830 (0x33e), region = 36 }
   0xa   : > { %676 = vmatprep.subr.bf16.mxu0 (!%p242_p3), %v780_v0  ;;  %354 = vst.msk [vmem:[#allocation4] sm:$0xff] (!%p242_p3), %vm353_vm0, %v780_v0  ;;  %678 = vmatprep.mubr.msk.bf16.mxu0 (!%p242_p3), %vm781_vm1, %v780_v0  ;;  %vm350_vm2 = vcmask (!%p242_p3), 7168   ;;  %v783_v5 = vmov (!%p242_p3), -inf   ;;  %v408_v6 = vlaneseq (!%p242_p3)  ;;  %vm450_vm5 = vcmask (!%p242_p3), 1043456  }
   0xb   : > { %682 = vmatprep.subr.bf16.mxu1 (!%p242_p3), %v780_v0  ;;  %684 = vmatprep.mubr.msk.bf16.mxu1 (!%p242_p3), %vm781_vm1, %v780_v0  ;;  %351 = vst.msk [vmem:[#allocation2] sm:$0xff] (!%p242_p3), %vm350_vm2, %v783_v5  ;;  %352 = vst.msk [vmem:[#allocation3] sm:$0xff] (!%p242_p3), %vm350_vm2, %v780_v0  ;;  %vm510_vm6 = vcmask (!%p242_p3), 60416  }
   0xc   : > { %732 = vset.pattern.permute.xlu0 (!%p242_p3), %v782_v4  ;;  %733 = vset.pattern.permute.xlu1 (!%p242_p3), %v782_v4  ;;  %v409_v8 = vshrl.u32 (!%p242_p3), %v408_v6, 7 }
   0xe   : > { %v410_v9 = vsub.s32 (!%p242_p3), 0, %v409_v8 }
  0x10   : > { %s902_s16 = smov (!%p301_p5, %s766_s16), 1  ;;  %s904_s15 = smov (!%p309_p6, %s762_s15), 3 }
  0x11   : > { %s660_s22 = sshll.u32 %s902_s16, 2  ;;  %s306_s7 = scalar_lea.vmem %s886_s0, %s902_s16  ;;  %v438_v39 = vld [vmem:[#allocation4] sm:$0xff] }
  0x12   : > { %s312_s23 = sadd.s32 %s660_s22, %s904_s15  ;;  %v405_v7 = vld [vmem:[%s306_s7] sm:$0x1]  ;;  %v430_v33 = vld [vmem:[#allocation3] sm:$0xff] }
  0x13   : > { %s840_s24 = sshll.u32 %s312_s23, 2  ;;  %vm406_vm3 = vcmp.gt.f32.partialorder %v405_v7, 0.0  ;;  %v414_v19 = vld [vmem:[#allocation2] sm:$0xff] }
  0x14   : > { %s325_s27 = scalar_lea.vmem %s888_s2, %s840_s24  ;;  %s314_s30 = scalar_lea.vmem %s887_s1, %s840_s24  ;;  %v407_v10 = vsel %vm406_vm3, 1, %v782_v4 }
  0x15   : > { %v356_v1 = vld [vmem:[%s325_s27] sm:$0xf]  ;;  %v411_v11 = vrot.slane %v407_v10, %v410_v9  ;;  %s336_s10 = scalar_lea.vmem %s889_s3, %s840_s24  ;;  %s344_s13 = scalar_lea.vmem %s890_s4, %s840_s24 }
  0x16   : > { %v362_v2 = vsel %vm353_vm0, %v356_v1, 0  ;;  %v355_v3 = vld [vmem:[%s314_s30] sm:$0xf] }
  0x17   : > { %677 = vmatpush3.bf16.xpose.msra.mxu0 %v362_v2  ;;  %vm412_vm4 = vcmp.eq.s32.totalorder %v411_v11, 1  ;;  %v446_v23 = vld [vmem:[%s336_s10] sm:$0xf] }
  0x18   : > { %v452_v24 = vsel %vm450_vm5, %v446_v23, 0 }
  0x19   : > { %683 = vmatpush3.bf16.msra.mxu1 %v452_v24 }
  0x1e   : > { %679 = vmatmul.mubr.msk.bf16.vlgmr.msra.gmra.mrb[0].mxu0 %vm353_vm0, %v355_v3 }
  0xf1   : > { %v398_v12 = vpop.f32.mrb[0].mxu0 }
  0xf2   : > { %v404_v13 = vmul.f32 0.35355338, %v398_v12  ;;  %v680_v14 = vpop.f32.mrb[1].mxu0 }
  0xf3   : > { %v401_v15 = vpop.f32.mrb[2].mxu0 }
  0xf4   : > { %v681_v16 = vpop.f32.mrb[3].mxu0  ;;  %v413_v17 = vsel %vm412_vm4, %v404_v13, -1e+09 }
  0xf5   : > { %v415_v18 = vsel %vm353_vm0, %v413_v17, -inf }
  0xf6   : > { %416 = vmax.xlane.f32.xlu0 %v415_v18 }
 0x183   : > { %v417_v20 = vpop.xlane.xlu0 %416 }
 0x184   : > { %v418_v21 = vmax.f32 %v414_v19, %v417_v20 }
 0x186   : > { %v419_v22 = vsub.f32 %v414_v19, %v418_v21  ;;  %496 = vst.msk [vmem:[#allocation2] sm:$0xff] %vm350_vm2, %v418_v21  ;;  %424 = vperm.xlu0 %732, %v418_v21  }
 0x188   : > { %v420_v31 = vmul.f32 1.442695, %v419_v22 }
 0x205   : > { %v425_v25 = vpop.permute.xlu0 %424 }
 0x206   : > { %v427_v26 = vsub.f32 %v413_v17, %v425_v25 }
 0x208   : > { %v428_v27 = vmul.f32 1.442695, %v427_v26 }
 0x20a   : > { %734 = vpow2.f32 %v428_v27 }
 0x20b   : > { %736 = vpow2.f32 %v420_v31 }
 0x214   : > { %v735_v28 = vpop.eup %734 }
 0x215   : > { %v432_v29 = vsel %vm353_vm0, %v735_v28, 0.0  ;;  %v445_v30 = vpack.c.bf16 %v735_v28, %v735_v28  ;;  %v737_v32 = vpop.eup %736 }
 0x216   : > { %433 = vadd.xlane.f32.xlu1 %v432_v29  ;;  %v431_v34 = vmul.f32 %v737_v32, %v430_v33 }
 0x217   : > { %685 = vmatmul.mubr.msk.bf16.vlgmr.msra.gmra.mrb[0].mxu1 %vm353_vm0, %v445_v30 }
 0x227   : > { %441 = vperm.xlu1 %733, %v737_v32  }
 0x2a3   : > { %v434_v35 = vpop.xlane.xlu1 %433 }
 0x2a4   : > { %v435_v36 = vadd.f32 %v434_v35, %v431_v34 }
 0x2a6   : > { %437 = vst.msk [vmem:[#allocation3] sm:$0xff] %vm350_vm2, %v435_v36 }
 0x2a7   : > { %v442_v40 = vpop.permute.xlu1 %441 }
 0x2a8   : > { %v444_v41 = vmul.f32 %v442_v40, %v438_v39 }
 0x2ad   : > { %v501_v37 = vld [vmem:[#allocation3] sm:$0xff] }
 0x2ae   : > { %738 = vrcp.f32 %v501_v37 }
 0x2b8   : > { %v739_v38 = vpop.eup %738 }
 0x2b9   : > { %505 = vperm.xlu1 %733, %v739_v38  }
 0x2ea   : > { %v488_v42 = vpop.f32.mrb[0].mxu1 }
 0x2eb   : > { %v494_v43 = vadd.f32 %v488_v42, %v444_v41  ;;  %v686_v44 = vpop.f32.mrb[1].mxu1 }
 0x2ec   : > { %v491_v45 = vpop.f32.mrb[2].mxu1 }
 0x2ed   : > { %495 = vst.msk [vmem:[#allocation4] sm:$0xff] %vm353_vm0, %v494_v43  ;;  %v687_v46 = vpop.f32.mrb[3].mxu1 }
 0x2f4   : > { %v500_v47 = vld [vmem:[#allocation4] sm:$0xff] }
 0x338   : > { %v506_v48 = vpop.permute.xlu1 %505 }
 0x339   : > { %v508_v49 = vmul.f32 %v506_v48, %v500_v47 }
 0x33b   : > { %v509_v50 = vpack.c.bf16 %v508_v49, %v508_v49 }
 0x33d   : > { %511 = vst.msk [vmem:[%s344_s13] sm:$0xf] %vm510_vm6, %v509_v50 }
 0x33e PF: > { %s14_s19 = sadd.s32 1, %s778_s19   ;;  %s891_s15 = smov %s770_s17 }
 0x33f   : > { %p11_p7 = scmp.ge.s32.totalorder %s14_s19, 10   ;;  %s892_s16 = smov %s774_s18 }
 0x340   : > { %s893_s17 = smov %s896_s20  ;;  %s894_s18 = smov %s900_s21 }
 0x341   :  { %13 = sbr.rel (!%p11_p7) target bundleno = 3 (0x3), region = 83 }

// kernel: encoder_decoder_forward.44
= control target key start
LH: loop header
LB: loop body
LE: loop exit
PB: predicated region body
PF: predicated region fallthrough
CT: control target
= control target key end

     0   :  { %vm16_vm0 = vcmask 261120   ;;  %s118_s0 = inlined_call_operand.vmem [shape: f32[16,32], index: 0, kind: input, shape index: {}]   ;;  %s119_s1 = inlined_call_operand.vmem [shape: f32[1,32], index: 1, kind: input, shape index: {}]   ;;  %s120_s2 = inlined_call_operand.vmem [shape: f32[1,32], index: 2, kind: input, shape index: {}]   ;;  %s121_s3 = inlined_call_operand.vmem [shape: f32[16,32], index: 3, kind: output, shape index: {}]  }
   0x1   :  { %v14_v0 = vld [vmem:[%s118_s0] sm:$0xff]  ;;  %v15_v1 = vld [vmem:[%s118_s0 + $0x8] sm:$0xff] }
   0x2   :  { %v17_v2 = vsel %vm16_vm0, %v14_v0, 0.0  ;;  %v20_v3 = vsel %vm16_vm0, %v15_v1, 0.0  ;;  %v68_v21 = vld [vmem:[%s119_s1] ss:$0 sm:$0xff] }
   0x3   :  { %18 = vadd.xlane.f32.xlu0 %v17_v2  ;;  %v69_v23 = vld [vmem:[%s120_s2] ss:$0 sm:$0xff] }
   0x7   :  { %21 = vadd.xlane.f32.xlu0 %v20_v3 }
  0x90   :  { %v19_v4 = vpop.xlane.xlu0 %18 }
  0x91   :  { %v24_v5 = vmul.f32 0.03125, %v19_v4 }
  0x93   :  { %v26_v6 = vsub.f32 %v14_v0, %v24_v5 }
  0x94   :  { %v22_v7 = vpop.xlane.xlu0 %21 }
  0x95   :  { %v25_v8 = vmul.f32 0.03125, %v22_v7  ;;  %v28_v9 = vmul.f32 %v26_v6, %v26_v6 }
  0x97   :  { %v27_v10 = vsub.f32 %v15_v1, %v25_v8  ;;  %v30_v11 = vsel %vm16_vm0, %v28_v9, 0.0 }
  0x98   :  { %31 = vadd.xlane.f32.xlu1 %v30_v11 }
  0x99   :  { %v29_v12 = vmul.f32 %v27_v10, %v27_v10 }
  0x9b   :  { %v33_v13 = vsel %vm16_vm0, %v29_v12, 0.0 }
  0x9c   :  { %34 = vadd.xlane.f32.xlu1 %v33_v13 }
 0x125   :  { %v32_v14 = vpop.xlane.xlu1 %31 }
 0x126   :  { %v36_v15 = vmul.f32 0.03125, %v32_v14 }
 0x128   :  { %v38_v16 = vadd.f32 1e-06, %v36_v15 }
 0x129   :  { %v35_v17 = vpop.xlane.xlu1 %34 }
 0x12a   :  { %70 = vrsqrt.f32 %v38_v16  ;;  %v37_v18 = vmul.f32 0.03125, %v35_v17 }
 0x12c   :  { %v39_v19 = vadd.f32 1e-06, %v37_v18 }
 0x12e   :  { %72 = vrsqrt.f32 %v39_v19 }
 0x134   :  { %v71_v20 = vpop.eup %70 }
 0x135   :  { %v42_v22 = vmul.f32 %v71_v20, %v26_v6 }
 0x137   :  { %v51_v24 = vmul.f32 %v68_v21, %v42_v22 }
 0x138   :  { %v73_v25 = vpop.eup %72 }
 0x139   :  { %v60_v26 = vadd.f32 %v69_v23, %v51_v24  ;;  %v43_v27 = vmul.f32 %v73_v25, %v27_v10 }
 0x13b   :  { %62 = vst.msk [vmem:[%s121_s3] sm:$0xff] %vm16_vm0, %v60_v26  ;;  %v52_v28 = vmul.f32 %v68_v21, %v43_v27 }
 0x13d   :  { %v61_v29 = vadd.f32 %v69_v23, %v52_v28 }
 0x13f   :  { %63 = vst.msk [vmem:[%s121_s3 + $0x8] sm:$0xff] %vm16_vm0, %v61_v29 }

// kernel: encoder_decoder_forward.37
= control target key start
LH: loop header
LB: loop body
LE: loop exit
PB: predicated region body
PF: predicated region fallthrough
CT: control target
= control target key end

     0   :  { %vm23_vm0 = vcmask 261120   ;;  %v183_v15 = vmov 0.0   ;;  %vm184_vm1 = vmmov 0   ;;  %vm147_vm2 = vcmask 519168   ;;  %s247_s0 = inlined_call_operand.vmem [shape: f32[16,32], index: 0, kind: input, shape index: {}]   ;;  %s248_s3 = inlined_call_operand.vmem [shape: bf16[32,64], index: 3, kind: input, shape index: {}]   ;;  %s249_s1 = inlined_call_operand.vmem [shape: f32[1,32], index: 1, kind: input, shape index: {}]   ;;  %s250_s2 = inlined_call_operand.vmem [shape: f32[1,32], index: 2, kind: input, shape index: {}]   ;;  %s251_s4 = inlined_call_operand.vmem [shape: f32[1,64], index: 4, kind: input, shape index: {}]   ;;  %s252_s5 = inlined_call_operand.vmem [shape: bf16[16,64], index: 5, kind: output, shape index: {}]  }
   0x1   :  { %v21_v0 = vld [vmem:[%s247_s0] sm:$0xff]  ;;  %v22_v1 = vld [vmem:[%s247_s0 + $0x8] sm:$0xff]  ;;  %167 = vmatprep.subr.bf16.mxu0 %v183_v15  ;;  %171 = vmatprep.mubr.msk.bf16.mxu0 %vm184_vm1, %v183_v15 }
   0x2   :  { %v24_v2 = vsel %vm23_vm0, %v21_v0, 0.0  ;;  %v27_v3 = vsel %vm23_vm0, %v22_v1, 0.0  ;;  %v177_v14 = vld [vmem:[%s248_s3] sm:$0xff]   ;;  %v178_v16 = vld [vmem:[%s248_s3 + $0x8] sm:$0xff]  }
   0x3   :  { %25 = vadd.xlane.f32.xlu0 %v24_v2  ;;  %168 = vmatpush3.bf16.msra.mxu0 %v177_v14  ;;  %v154_v25 = vld [vmem:[%s249_s1] ss:$0 sm:$0xff] }
   0x4   :  { %169 = vmatprep.subr.bf16.mxu0 %v183_v15  ;;  %v155_v29 = vld [vmem:[%s250_s2] ss:$0 sm:$0xff] }
   0x5   :  { %v156_v34 = vld [vmem:[%s251_s4] ss:$0 sm:$0xff] }
   0x7   :  { %28 = vadd.xlane.f32.xlu0 %v27_v3  ;;  %170 = vmatpush3.bf16.msra.mxu0 %v178_v16 }
  0x90   :  { %v26_v4 = vpop.xlane.xlu0 %25 }
  0x91   :  { %v31_v5 = vmul.f32 0.03125, %v26_v4 }
  0x93   :  { %v33_v6 = vsub.f32 %v21_v0, %v31_v5 }
  0x94   :  { %v29_v7 = vpop.xlane.xlu0 %28 }
  0x95   :  { %v32_v8 = vmul.f32 0.03125, %v29_v7  ;;  %v35_v9 = vmul.f32 %v33_v6, %v33_v6 }
  0x97   :  { %v34_v10 = vsub.f32 %v22_v1, %v32_v8  ;;  %v37_v11 = vsel %vm23_vm0, %v35_v9, 0.0 }
  0x98   :  { %38 = vadd.xlane.f32.xlu1 %v37_v11 }
  0x99   :  { %v36_v12 = vmul.f32 %v34_v10, %v34_v10 }
  0x9b   :  { %v40_v13 = vsel %vm23_vm0, %v36_v12, 0.0 }
  0x9c   :  { %41 = vadd.xlane.f32.xlu1 %v40_v13 }
 0x125   :  { %v39_v17 = vpop.xlane.xlu1 %38 }
 0x126   :  { %v43_v18 = vmul.f32 0.03125, %v39_v17 }
 0x128   :  { %v45_v19 = vadd.f32 1e-06, %v43_v18 }
 0x129   :  { %v42_v20 = vpop.xlane.xlu1 %41 }
 0x12a   :  { %179 = vrsqrt.f32 %v45_v19  ;;  %v44_v21 = vmul.f32 0.03125, %v42_v20 }
 0x12c   :  { %v46_v22 = vadd.f32 1e-06, %v44_v21 }
 0x12e   :  { %181 = vrsqrt.f32 %v46_v22 }
 0x134   :  { %v180_v23 = vpop.eup %179 }
 0x135   :  { %v49_v24 = vmul.f32 %v180_v23, %v33_v6 }
 0x137   :  { %v58_v28 = vmul.f32 %v154_v25, %v49_v24 }
 0x138   :  { %v182_v26 = vpop.eup %181 }
 0x139   :  { %v50_v27 = vmul.f32 %v182_v26, %v34_v10  ;;  %v67_v31 = vadd.f32 %v155_v29, %v58_v28 }
 0x13b   :  { %v59_v30 = vmul.f32 %v154_v25, %v50_v27 }
 0x13d   :  { %v68_v32 = vadd.f32 %v155_v29, %v59_v30 }
 0x13f   :  { %v69_v33 = vpack.c.bf16 %v68_v32, %v67_v31 }
 0x141   :  { %172 = vmatmul.mubr.msk.bf16.vlgmr.msra.gmra.mrb[0].mxu0 %vm23_vm0, %v69_v33 }
 0x214   :  { %v130_v35 = vpop.f32.mrb[0].mxu0 }
 0x215   :  { %v131_v36 = vadd.f32 %v156_v34, %v130_v35  ;;  %v173_v37 = vpop.f32.mrb[1].mxu0 }
 0x216   :  { %v133_v38 = vpop.f32.mrb[2].mxu0 }
 0x217   :  { %v137_v39 = vmax.f32 %v131_v36, 0.0  ;;  %v134_v40 = vadd.f32 %v156_v34, %v133_v38  ;;  %v174_v41 = vpop.f32.mrb[3].mxu0 }
 0x219   :  { %v162_v42 = vpack.c.bf16 %v137_v39, %v137_v39  ;;  %v138_v43 = vmax.f32 %v134_v40, 0.0 }
 0x21b   :  { %148 = vst.msk [vmem:[%s252_s5] sm:$0xf] %vm147_vm2, %v162_v42  ;;  %v163_v44 = vpack.c.bf16 %v138_v43, %v138_v43 }
 0x21d   :  { %149 = vst.msk [vmem:[%s252_s5 + $0x4] sm:$0xf] %vm147_vm2, %v163_v44 }

// kernel: encoder_decoder_forward.50
= control target key start
LH: loop header
LB: loop body
LE: loop exit
PB: predicated region body
PF: predicated region fallthrough
CT: control target
= control target key end

     0   :  { %v124_v0 = vmov 0.0   ;;  %vm125_vm0 = vmmov 0   ;;  %vm41_vm1 = vcmask 261120   ;;  %vm94_vm2 = vcmask 519168   ;;  %s167_s1 = inlined_call_operand.vmem [shape: bf16[32,64], index: 1, kind: input, shape index: {}]   ;;  %s168_s0 = inlined_call_operand.vmem [shape: f32[16,32], index: 0, kind: input, shape index: {}]   ;;  %s169_s2 = inlined_call_operand.vmem [shape: f32[1,64], index: 2, kind: input, shape index: {}]   ;;  %s170_s3 = inlined_call_operand.vmem [shape: bf16[16,64], index: 3, kind: output, shape index: {}]  }
   0x1   :  { %112 = vmatprep.subr.bf16.mxu0 %v124_v0  ;;  %v122_v1 = vld [vmem:[%s167_s1] sm:$0xff]   ;;  %116 = vmatprep.mubr.msk.bf16.mxu0 %vm125_vm0, %v124_v0  ;;  %v123_v2 = vld [vmem:[%s167_s1 + $0x8] sm:$0xff]  }
   0x2   :  { %113 = vmatpush3.bf16.msra.mxu0 %v122_v1  ;;  %v15_v3 = vld [vmem:[%s168_s0] sm:$0xff]  ;;  %v16_v4 = vld [vmem:[%s168_s0 + $0x8] sm:$0xff] }
   0x3   :  { %114 = vmatprep.subr.bf16.mxu0 %v124_v0  ;;  %v17_v5 = vpack.c.bf16 %v16_v4, %v15_v3  ;;  %v101_v6 = vld [vmem:[%s169_s2] ss:$0 sm:$0xff] }
   0x6   :  { %115 = vmatpush3.bf16.msra.mxu0 %v123_v2 }
   0x9   :  { %117 = vmatmul.mubr.msk.bf16.vlgmr.msra.gmra.mrb[0].mxu0 %vm41_vm1, %v17_v5 }
  0xdc   :  { %v79_v7 = vpop.f32.mrb[0].mxu0 }
  0xdd   :  { %v80_v8 = vadd.f32 %v101_v6, %v79_v7  ;;  %v118_v9 = vpop.f32.mrb[1].mxu0 }
  0xde   :  { %v82_v10 = vpop.f32.mrb[2].mxu0 }
  0xdf   :  { %v107_v11 = vpack.c.bf16 %v80_v8, %v80_v8  ;;  %v83_v12 = vadd.f32 %v101_v6, %v82_v10  ;;  %v119_v13 = vpop.f32.mrb[3].mxu0 }
  0xe1   :  { %95 = vst.msk [vmem:[%s170_s3] sm:$0xf] %vm94_vm2, %v107_v11  ;;  %v108_v14 = vpack.c.bf16 %v83_v12, %v83_v12 }
  0xe3   :  { %96 = vst.msk [vmem:[%s170_s3 + $0x4] sm:$0xf] %vm94_vm2, %v108_v14 }

// kernel: encoder_decoder_forward.65
= control target key start
LH: loop header
LB: loop body
LE: loop exit
PB: predicated region body
PF: predicated region fallthrough
CT: control target
= control target key end

     0   :  { %s119_s0 = inlined_call_operand.vmem [shape: f32[16,32], index: 0, kind: input, shape index: {}]   ;;  %s120_s1 = inlined_call_operand.vmem [shape: f32[16,1], index: 1, kind: input, shape index: {}]   ;;  %s121_s2 = inlined_call_operand.hbm [shape: f32[16,32], index: 2, kind: output, shape index: {}]  }
   0x1   :  { %v14_v0 = vld [vmem:[%s120_s1] sm:$0xff] }
   0x2   :  { %7 = vsyncpa [#allocation3], 0  ;;  %v76_v1 = vmov 0   ;;  %v15_v2 = vld [vmem:[%s120_s1 + $0x8] sm:$0xff]  ;;  %v12_v3 = vld [vmem:[%s119_s0] sm:$0xff]  ;;  %vm28_vm0 = vcmask 261120  }
   0x3   :  { %51 = vset.pattern.permute.xlu0 %v76_v1  ;;  %s77_s15 = smov [#allocation2]   ;;  %v13_v6 = vld [vmem:[%s119_s0 + $0x8] sm:$0xff] }
   0x4   :  { %18 = vperm.xlu0 %51, %v14_v0   ;;  %s36_s16 = sshll.u32 %s77_s15, 4  ;;  %s37_s16 = int_to_ptr.vmem [resolvable:$true] %s36_s16 }
   0x5   :  { %s52_s1 = scalar_lea.vmem %s37_s16, 256  ;;  %p57_p1 = scmp.lt.s32.totalorder %s37_s16, %s37_s16 }
   0x6   :  { %p53_p0 = scmp.ne.s32.totalorder %s37_s16, %s52_s1  ;;  %p58_p2 = scmp.lt.s32.totalorder %s52_s1, %s52_s1 }
   0x8   :  { %23 = vperm.xlu0 %51, %v15_v2   ;;  %p59_p3 = por %p58_p2, %p57_p1 }
   0xa   :  { %p60_p4 = pnand %p59_p3, %p53_p0 }
  0x83   :  { %v19_v4 = vpop.permute.xlu0 %18 }
  0x84   :  { %v26_v5 = vsub.f32 %v12_v3, %v19_v4 }
  0x86   :  { %29 = vst.msk [vmem:[#allocation2] sm:$0xff] %vm28_vm0, %v26_v5 }
  0x87   :  { %v24_v7 = vpop.permute.xlu0 %23 }
  0x88   :  { %v27_v8 = vsub.f32 %v13_v6, %v24_v7 }
  0x8a   :  { %30 = vst.msk [vmem:[#allocation2 + $0x8] sm:$0xff] %vm28_vm0, %v27_v8 }
  0x8b   :  { %63 = shalt.err (!%p60_p4)
}
  0x8c   :  { %s64_s21 = scalar_lea.hbm %s121_s2, 256 }
  0x8d   :  { %p65_p5 = scmp.ne.s32.totalorder %s121_s2, %s64_s21  ;;  %p68_p6 = scmp.lt.u32.totalorder %s64_s21, %s121_s2 }
  0x8f   :  { %p70_p7 = pnand %p68_p6, %p65_p5 }
  0x91   :  { %73 = shalt.err (!%p70_p7)
}
  0x92   :  { %s78_s25 = smov 128   ;;  %s79_s26 = smov 8  }
  0x93   :  { %42 = dma.vmem_to_hbm [thread:$0]  %s37_s16, 256, %s121_s2, [#allocation3], %s78_s25, %s78_s25, %s79_s26  }
  0x94   :  { %74 = dma.done.wait [#allocation3], 256  }
  0x95   :  { %75 = vsyncadd [#allocation3], 4294967040 }
  0x96   :  { %46 = vsyncpa [#allocation3], 1 }

// kernel: encoder_decoder_forward.64
= control target key start
LH: loop header
LB: loop body
LE: loop exit
PB: predicated region body
PF: predicated region fallthrough
CT: control target
= control target key end

     0   :  { %vm34_vm0 = vcmask 261120   ;;  %v263_v15 = vmov 0.0   ;;  %vm264_vm1 = vmmov 0   ;;  %vm27_vm2 = vcmask 7168   ;;  %s356_s0 = inlined_call_operand.vmem [shape: f32[16,32], index: 0, kind: input, shape index: {}]   ;;  %s357_s3 = inlined_call_operand.vmem [shape: bf16[32,32], index: 3, kind: input, shape index: {}]   ;;  %s358_s1 = inlined_call_operand.vmem [shape: f32[1,32], index: 1, kind: input, shape index: {}]   ;;  %s359_s2 = inlined_call_operand.vmem [shape: f32[1,32], index: 2, kind: input, shape index: {}]   ;;  %s360_s4 = inlined_call_operand.vmem [shape: f32[1,32], index: 4, kind: input, shape index: {}]   ;;  %s361_s5 = inlined_call_operand.vmem [shape: f32[16,32], index: 5, kind: output, shape index: {0}]   ;;  %s362_s6 = inlined_call_operand.vmem [shape: f32[16,1], index: 6, kind: output, shape index: {1}]  }
   0x1   :  { %v32_v0 = vld [vmem:[%s356_s0] sm:$0xff]  ;;  %v33_v1 = vld [vmem:[%s356_s0 + $0x8] sm:$0xff]  ;;  %231 = vmatprep.subr.bf16.mxu0 %v263_v15  ;;  %235 = vmatprep.mubr.msk.bf16.mxu0 %vm264_vm1, %v263_v15  ;;  %v265_v34 = vmov -inf   ;;  %30 = vst.msk [vmem:[#allocation3] sm:$0xff] %vm27_vm2, %v263_v15  ;;  %31 = vst.msk [vmem:[#allocation3 + $0x8] sm:$0xff] %vm27_vm2, %v263_v15  ;;  %v266_v44 = vmov 0  }
   0x2   :  { %v35_v2 = vsel %vm34_vm0, %v32_v0, 0.0  ;;  %v38_v3 = vsel %vm34_vm0, %v33_v1, 0.0  ;;  %v245_v14 = vld [vmem:[%s357_s3] sm:$0xff]   ;;  %v246_v16 = vld [vmem:[%s357_s3 + $0x8] sm:$0xff]   ;;  %28 = vst.msk [vmem:[#allocation2] sm:$0xff] %vm27_vm2, %v265_v34  ;;  %29 = vst.msk [vmem:[#allocation2 + $0x8] sm:$0xff] %vm27_vm2, %v265_v34  ;;  %243 = vset.pattern.permute.xlu0 %v266_v44  ;;  %244 = vset.pattern.permute.xlu1 %v266_v44 }
   0x3   :  { %36 = vadd.xlane.f32.xlu0 %v35_v2  ;;  %232 = vmatpush3.bf16.msra.mxu0 %v245_v14  ;;  %v222_v25 = vld [vmem:[%s358_s1] ss:$0 sm:$0xff] }
   0x4   :  { %233 = vmatprep.subr.bf16.mxu0 %v263_v15  ;;  %v223_v29 = vld [vmem:[%s359_s2] ss:$0 sm:$0xff] }
   0x5   :  { %v224_v35 = vld [vmem:[%s360_s4] ss:$0 sm:$0xff] }
   0x7   :  { %39 = vadd.xlane.f32.xlu0 %v38_v3  ;;  %234 = vmatpush3.bf16.msra.mxu0 %v246_v16 }
   0x8   :  { %v160_v2 = vld [vmem:[#allocation3] sm:$0xff] }
   0x9   :  { %v150_v45 = vld [vmem:[#allocation2] sm:$0xff]  ;;  %v151_v47 = vld [vmem:[#allocation2 + $0x8] sm:$0xff] }
  0x90   :  { %v37_v4 = vpop.xlane.xlu0 %36 }
  0x91   :  { %v42_v5 = vmul.f32 0.03125, %v37_v4  ;;  %v161_v4 = vld [vmem:[#allocation3 + $0x8] sm:$0xff] }
  0x93   :  { %v44_v6 = vsub.f32 %v32_v0, %v42_v5 }
  0x94   :  { %v40_v7 = vpop.xlane.xlu0 %39 }
  0x95   :  { %v43_v8 = vmul.f32 0.03125, %v40_v7  ;;  %v46_v9 = vmul.f32 %v44_v6, %v44_v6 }
  0x97   :  { %v45_v10 = vsub.f32 %v33_v1, %v43_v8  ;;  %v48_v11 = vsel %vm34_vm0, %v46_v9, 0.0 }
  0x98   :  { %49 = vadd.xlane.f32.xlu1 %v48_v11 }
  0x99   :  { %v47_v12 = vmul.f32 %v45_v10, %v45_v10 }
  0x9b   :  { %v51_v13 = vsel %vm34_vm0, %v47_v12, 0.0 }
  0x9c   :  { %52 = vadd.xlane.f32.xlu1 %v51_v13 }
 0x125   :  { %v50_v17 = vpop.xlane.xlu1 %49 }
 0x126   :  { %v54_v18 = vmul.f32 0.03125, %v50_v17 }
 0x128   :  { %v56_v19 = vadd.f32 1e-06, %v54_v18 }
 0x129   :  { %v53_v20 = vpop.xlane.xlu1 %52 }
 0x12a   :  { %247 = vrsqrt.f32 %v56_v19  ;;  %v55_v21 = vmul.f32 0.03125, %v53_v20 }
 0x12c   :  { %v57_v22 = vadd.f32 1e-06, %v55_v21 }
 0x12e   :  { %249 = vrsqrt.f32 %v57_v22 }
 0x134   :  { %v248_v23 = vpop.eup %247 }
 0x135   :  { %v60_v24 = vmul.f32 %v248_v23, %v44_v6 }
 0x137   :  { %v69_v28 = vmul.f32 %v222_v25, %v60_v24 }
 0x138   :  { %v250_v26 = vpop.eup %249 }
 0x139   :  { %v61_v27 = vmul.f32 %v250_v26, %v45_v10  ;;  %v78_v31 = vadd.f32 %v223_v29, %v69_v28 }
 0x13b   :  { %v70_v30 = vmul.f32 %v222_v25, %v61_v27 }
 0x13d   :  { %v79_v32 = vadd.f32 %v223_v29, %v70_v30 }
 0x13f   :  { %v80_v33 = vpack.c.bf16 %v79_v32, %v78_v31 }
 0x141   :  { %236 = vmatmul.mubr.msk.bf16.vlgmr.msra.gmra.mrb[0].mxu0 %vm34_vm0, %v80_v33 }
 0x214   :  { %v141_v36 = vpop.f32.mrb[0].mxu0 }
 0x215   :  { %v142_v37 = vadd.f32 %v224_v35, %v141_v36  ;;  %v237_v38 = vpop.f32.mrb[1].mxu0 }
 0x216   :  { %v144_v39 = vpop.f32.mrb[2].mxu0 }
 0x217   :  { %148 = vst.msk [vmem:[%s361_s5] sm:$0xff] %vm34_vm0, %v142_v37  ;;  %v145_v40 = vadd.f32 %v224_v35, %v144_v39  ;;  %v238_v41 = vpop.f32.mrb[3].mxu0  ;;  %v152_v42 = vsel %vm34_vm0, %v142_v37, -inf }
 0x218   :  { %153 = vmax.xlane.f32.xlu0 %v152_v42 }
 0x219   :  { %149 = vst.msk [vmem:[%s361_s5 + $0x8] sm:$0xff] %vm34_vm0, %v145_v40  ;;  %v155_v43 = vsel %vm34_vm0, %v145_v40, -inf }
 0x21a   :  { %156 = vmax.xlane.f32.xlu1 %v155_v43 }
 0x2a5   :  { %v154_v46 = vpop.xlane.xlu0 %153 }
 0x2a6   :  { %v158_v48 = vmax.f32 %v150_v45, %v154_v46 }
 0x2a7   :  { %v157_v49 = vpop.xlane.xlu1 %156 }
 0x2a8   :  { %v162_v50 = vsub.f32 %v150_v45, %v158_v48  ;;  %197 = vst.msk [vmem:[#allocation2] sm:$0xff] %vm27_vm2, %v158_v48  ;;  %v159_v51 = vmax.f32 %v151_v47, %v157_v49  ;;  %172 = vperm.xlu0 %243, %v158_v48  }
 0x2aa   :  { %v163_v52 = vsub.f32 %v151_v47, %v159_v51  ;;  %198 = vst.msk [vmem:[#allocation2 + $0x8] sm:$0xff] %vm27_vm2, %v159_v51  ;;  %177 = vperm.xlu1 %244, %v159_v51   ;;  %v164_v63 = vmul.f32 1.442695, %v162_v50 }
 0x2ac   :  { %v166_v0 = vmul.f32 1.442695, %v163_v52 }
 0x2af   :  { %v202_v16 = vld [vmem:[#allocation2] sm:$0xff] }
 0x2b1   :  { %v203_v19 = vld [vmem:[#allocation2 + $0x8] sm:$0xff] }
 0x327   :  { %v173_v53 = vpop.permute.xlu0 %172 }
 0x328   :  { %v180_v54 = vsub.f32 %v142_v37, %v173_v53 }
 0x329   :  { %v178_v55 = vpop.permute.xlu1 %177 }
 0x32a   :  { %v182_v56 = vmul.f32 1.442695, %v180_v54  ;;  %v181_v57 = vsub.f32 %v145_v40, %v178_v55 }
 0x32c   :  { %251 = vpow2.f32 %v182_v56  ;;  %v184_v58 = vmul.f32 1.442695, %v181_v57 }
 0x32e   :  { %253 = vpow2.f32 %v184_v58 }
 0x32f   :  { %255 = vpow2.f32 %v164_v63 }
 0x330   :  { %257 = vpow2.f32 %v166_v0 }
 0x336   :  { %v252_v59 = vpop.eup %251 }
 0x337   :  { %v186_v60 = vsel %vm34_vm0, %v252_v59, 0.0 }
 0x338   :  { %v254_v61 = vpop.eup %253  ;;  %187 = vadd.xlane.f32.xlu1 %v186_v60 }
 0x339   :  { %v189_v62 = vsel %vm34_vm0, %v254_v61, 0.0  ;;  %v256_v1 = vpop.eup %255 }
 0x33a   :  { %190 = vadd.xlane.f32.xlu0 %v189_v62  ;;  %v258_v3 = vpop.eup %257  ;;  %v168_v5 = vmul.f32 %v256_v1, %v160_v2 }
 0x33b   :  { %v169_v8 = vmul.f32 %v258_v3, %v161_v4 }
 0x3c5   :  { %v188_v6 = vpop.xlane.xlu1 %187 }
 0x3c6   :  { %v192_v7 = vadd.f32 %v188_v6, %v168_v5 }
 0x3c7   :  { %v191_v9 = vpop.xlane.xlu0 %190 }
 0x3c8   :  { %195 = vst.msk [vmem:[#allocation3] sm:$0xff] %vm27_vm2, %v192_v7  ;;  %v193_v10 = vadd.f32 %v191_v9, %v169_v8 }
 0x3ca   :  { %196 = vst.msk [vmem:[#allocation3 + $0x8] sm:$0xff] %vm27_vm2, %v193_v10 }
 0x3cf   :  { %v204_v11 = vld [vmem:[#allocation3] sm:$0xff] }
 0x3d0   :  { %259 = vlog2.f32 %v204_v11 }
 0x3d1   :  { %v205_v12 = vld [vmem:[#allocation3 + $0x8] sm:$0xff] }
 0x3d2   :  { %261 = vlog2.f32 %v205_v12 }
 0x3da   :  { %v260_v13 = vpop.eup %259 }
 0x3db   :  { %v207_v14 = vmul.f32 0.6931472, %v260_v13 }
 0x3dc   :  { %v262_v15 = vpop.eup %261 }
 0x3dd   :  { %v210_v17 = vadd.f32 %v207_v14, %v202_v16  ;;  %v209_v18 = vmul.f32 0.6931472, %v262_v15 }
 0x3df   :  { %212 = vst.msk [vmem:[%s362_s6] sm:$0xff] %vm27_vm2, %v210_v17  ;;  %v211_v20 = vadd.f32 %v209_v18, %v203_v19 }
 0x3e1   :  { %213 = vst.msk [vmem:[%s362_s6 + $0x8] sm:$0xff] %vm27_vm2, %v211_v20 }

</bundles_post_ra>
